<compile_context>
chip_gen: v7x
topology: tpu7x:2x2x1
jax: 0.10.0
libtpu: 0.0.40
codegen_flags: <defaults>
</compile_context>

<pallas_src>
import functools

import jax
import jax.numpy as jnp
from jax import lax
from jax.experimental import pallas as pl
from jax.experimental.pallas import tpu as pltpu


# --------------------------------------------------------------------------- #
# Shared conv helper (factored shift-MAC, ~12 rolls instead of 48).
# --------------------------------------------------------------------------- #
def _conv_plane(avg, mx, wmat, rmask, cmask, *, H, W, K, tap_matmul):
    """KxK conv (2->1 ch, zero pad, no bias) on lane-dense (1, H*W) planes.

    avg, mx : (1, HW) f32 channel-mean / channel-max planes.
    wmat    : (8, KK2_pad) f32, wmat[ky, 2*kx + c] = conv_w[0, c, ky, kx], zero padded.
    rmask   : (K, HW) 0/1 f32, row-validity per ky (depends on p // W only).
    cmask   : (K, HW) 0/1 f32, col-validity per kx (depends on p %  W only).
    """
    HW = H * W
    P = (K - 1) // 2
    cat = jnp.concatenate([avg, mx], axis=0)               # (2, HW)

    # Column-shifted, column-masked planes (one roll per kx, both planes at once).
    planes = []
    for kx in range(K):
        dx = kx - P
        shift = (-dx) % HW
        sh = pltpu.roll(cat, shift, 1) if shift else cat    # sh[q] = cat[(q+dx) % HW]
        planes.append(sh * cmask[kx:kx + 1, :])
    stacked = jnp.concatenate(planes, axis=0)               # (2K, HW)

    if tap_matmul:
        # All K row-partials in one small MXU matmul (padded to (8, 2K_pad)).
        pad = wmat.shape[1] - 2 * K
        if pad:
            stacked = jnp.concatenate(
                [stacked, jnp.zeros((pad, HW), jnp.float32)], axis=0)
        row_partials = jnp.dot(wmat, stacked,
                               preferred_element_type=jnp.float32)  # (8, HW)
    else:
        # VPU fallback (preferred on v5e: bf16/int-only MXU, f32 taps stay on VALU).
        row_partials = jnp.zeros((K, HW), jnp.float32)
        for c in range(2 * K):
            row_partials = row_partials + wmat[:K, c:c + 1] * stacked[c:c + 1, :]

    # One row roll (by dy*W) + row-mask per ky.  Valid because cmask depends only
    # on (p mod W) and therefore commutes with rolls by multiples of W.
    acc = jnp.zeros((1, HW), jnp.float32)
    for ky in range(K):
        dy = ky - P
        rp = row_partials[ky:ky + 1, :]
        shift = (-(dy * W)) % HW
        rp = pltpu.roll(rp, shift, 1) if shift else rp
        acc = acc + rp * rmask[ky:ky + 1, :]
    return acc                                              # (1, HW) f32


# --------------------------------------------------------------------------- #
# Fused single-call kernel (small problems: launch-bound regime).
# --------------------------------------------------------------------------- #
def _fused_kernel(gb_ref, wmat_ref, rmask_ref, cmask_ref, x_ref, o_ref,
                  *, N, C, H, W, K, eps, tap_matmul):
    HW = H * W
    wmat = wmat_ref[...]
    rmask = rmask_ref[...]
    cmask = cmask_ref[...]

    convs = []
    s = jnp.float32(0.0)
    for n in range(N):
        xf = x_ref[n].astype(jnp.float32)                   # (C, HW)
        avg = jnp.mean(xf, axis=0, keepdims=True)
        mx = jnp.max(xf, axis=0, keepdims=True)
        conv = _conv_plane(avg, mx, wmat, rmask, cmask,
                           H=H, W=W, K=K, tap_matmul=tap_matmul)
        convs.append(conv)
        s = s + jnp.sum(conv)

    cnt = jnp.float32(N * HW)
    mean = s / cnt
    v = jnp.float32(0.0)
    for n in range(N):
        d = convs[n] - mean
        v = v + jnp.sum(d * d)
    var = v / cnt                                            # biased batch variance

    a = gb_ref[0] * lax.rsqrt(var + eps)
    b = gb_ref[1] - mean * a

    for n in range(N):
        bn = convs[n] * a + b
        sig = 0.5 * (jnp.tanh(0.5 * bn) + 1.0)               # exact sigmoid via EUP tanh
        if x_ref.dtype == jnp.bfloat16:
            o_ref[n] = (x_ref[n] * sig.astype(jnp.bfloat16)).astype(o_ref.dtype)
        else:
            o_ref[n] = (x_ref[n].astype(jnp.float32) * sig).astype(o_ref.dtype)


# --------------------------------------------------------------------------- #
# Two-stage kernels (large problems).
# --------------------------------------------------------------------------- #
def _conv_stats_kernel(wmat_ref, rmask_ref, cmask_ref, x_ref, conv_ref, stats_ref,
                       *, H, W, K, tap_matmul):
    """Per-n: channel reductions + KxK conv + per-image BN partial stats."""
    xf = x_ref[0].astype(jnp.float32)                        # (C, HW)
    avg = jnp.mean(xf, axis=0, keepdims=True)
    mx = jnp.max(xf, axis=0, keepdims=True)
    conv = _conv_plane(avg, mx, wmat_ref[...], rmask_ref[...], cmask_ref[...],
                       H=H, W=W, K=K, tap_matmul=tap_matmul)  # (1, HW)
    conv_ref[0] = conv
    srow = jnp.full((1, 128), jnp.sum(conv), jnp.float32)
    ssrow = jnp.full((1, 128), jnp.sum(conv * conv), jnp.float32)
    stats_ref[0] = jnp.concatenate([srow, ssrow], axis=0)    # (2, 128)


def _gate_kernel(ab_ref, conv_ref, x_ref, o_ref):
    """Per (n, c-tile): out = x * sigmoid(a*conv + b) on lane-dense slabs."""
    a = ab_ref[0]
    b = ab_ref[1]
    bn = conv_ref[0] * a + b                                 # (1, HW) f32
    sig = 0.5 * (jnp.tanh(0.5 * bn) + 1.0)
    if x_ref.dtype == jnp.bfloat16:
        o_ref[0] = (x_ref[0] * sig.astype(jnp.bfloat16)).astype(o_ref.dtype)
    else:
        o_ref[0] = (x_ref[0].astype(jnp.float32) * sig).astype(o_ref.dtype)


# --------------------------------------------------------------------------- #
# Driver.
# --------------------------------------------------------------------------- #
def _pick_c_tile(C, HW, itemsize, budget=2 << 20):
    """Largest C tile whose (Ct, HW) slab is <= budget and satisfies (8,128) rules."""
    if C * HW * itemsize <= budget:
        return C
    ct_max = min(C, max(1, budget // (HW * itemsize)))
    for ct in range(ct_max, 0, -1):
        if C % ct == 0 and (ct % 8 == 0 or ct == C):
            return ct
    return C


def _vmem_limit_bytes(*buffer_bytes):
    est = 2 * sum(int(b) for b in buffer_bytes) + (4 << 20)   # double-buffer + margin
    return int(min(max(est, 32 << 20), 64 << 20))             # explicit (v5e default=16MiB)


def spatial_attention(x, conv_w, gamma, beta, *, eps=1e-5, tap_matmul=True,
                      small_fuse_bytes=2 << 20):
    """x: (N, C, H, W); conv_w: (1, 2, K, K) OIHW; gamma, beta: (1,) BN affine."""
    N, C, H, W = x.shape
    O, I, K, K2 = conv_w.shape
    assert O == 1 and I == 2 and K == K2 and K in (3, 7)
    P = (K - 1) // 2
    HW = H * W
    itemsize = x.dtype.itemsize

    x_flat = x.reshape(N, C, HW)                              # lane-dense spatial axis

    # Weight matrix for the factored conv: wmat[ky, 2*kx + c] = conv_w[0, c, ky, kx],
    # zero-padded to MXU-friendly (8, KK2_pad).
    KK2 = 2 * K
    KK2_pad = max(8, ((KK2 + 7) // 8) * 8)
    w_core = jnp.transpose(conv_w[0].astype(jnp.float32), (1, 2, 0)).reshape(K, KK2)
    wmat = jnp.zeros((8, KK2_pad), jnp.float32).at[:K, :KK2].set(w_core)

    # 0/1 border masks for the zero-padded conv (constants, tiny).
    pos = jnp.arange(HW, dtype=jnp.int32)
    row = pos // W
    col = pos % W
    row_mask = jnp.stack(
        [((row + ky - P) >= 0) & ((row + ky - P) < H) for ky in range(K)]
    ).astype(jnp.float32)                                     # (K, HW)
    col_mask = jnp.stack(
        [((col + kx - P) >= 0) & ((col + kx - P) < W) for kx in range(K)]
    ).astype(jnp.float32)                                     # (K, HW)

    smem_spec = pl.BlockSpec(memory_space=pltpu.MemorySpace.SMEM)

    # ---------------- Small problems: one fused launch (launch-bound). ----------------
    if N * C * HW * itemsize <= small_fuse_bytes and N <= 8:
        gb = jnp.stack([gamma.reshape(()), beta.reshape(())]).astype(jnp.float32)
        out_flat = pl.pallas_call(
            functools.partial(_fused_kernel, N=N, C=C, H=H, W=W, K=K, eps=eps,
                              tap_matmul=tap_matmul),
            out_shape=jax.ShapeDtypeStruct((N, C, HW), x.dtype),
            grid=(1,),
            in_specs=[
                smem_spec,                                        # (gamma, beta)
                pl.BlockSpec((8, KK2_pad), lambda i: (0, 0)),     # conv weight matrix
                pl.BlockSpec((K, HW), lambda i: (0, 0)),          # row masks
                pl.BlockSpec((K, HW), lambda i: (0, 0)),          # col masks
                pl.BlockSpec((N, C, HW), lambda i: (0, 0, 0)),    # x
            ],
            out_specs=pl.BlockSpec((N, C, HW), lambda i: (0, 0, 0)),
            compiler_params=pltpu.CompilerParams(
                dimension_semantics=("arbitrary",),
                vmem_limit_bytes=32 << 20),
        )(gb, wmat, row_mask, col_mask, x_flat)
        return out_flat.reshape(N, C, H, W)

    # ---------------- Large problems: two launches, tiled and parallel. ----------------
    # Stage 1: channel reductions + conv + per-n BN partial stats; grid over N.
    # (For extremely large C*HW per image, stage 1 would additionally need a C reduction
    #  axis with an "arbitrary" grid dim and VMEM sum/max accumulators.)
    vmem1 = _vmem_limit_bytes(C * HW * itemsize, HW * 4, 2 * K * HW * 4,
                              8 * KK2_pad * 4, 2 * 128 * 4)
    conv_cost = pl.CostEstimate(
        flops=N * HW * (2 * C + 6 * K * K),
        transcendentals=0,
        bytes_accessed=N * C * HW * itemsize + N * HW * 4 + 2 * K * HW * 4,
    )
    conv_out, stats = pl.pallas_call(
        functools.partial(_conv_stats_kernel, H=H, W=W, K=K, tap_matmul=tap_matmul),
        out_shape=(jax.ShapeDtypeStruct((N, 1, HW), jnp.float32),
                   jax.ShapeDtypeStruct((N, 2, 128), jnp.float32)),
        grid=(N,),
        in_specs=[
            pl.BlockSpec((8, KK2_pad), lambda n: (0, 0)),
            pl.BlockSpec((K, HW), lambda n: (0, 0)),
            pl.BlockSpec((K, HW), lambda n: (0, 0)),
            pl.BlockSpec((1, C, HW), lambda n: (n, 0, 0)),
        ],
        out_specs=(pl.BlockSpec((1, 1, HW), lambda n: (n, 0, 0)),
                   pl.BlockSpec((1, 2, 128), lambda n: (n, 0, 0))),
        compiler_params=pltpu.CompilerParams(
            dimension_semantics=("parallel",), vmem_limit_bytes=vmem1),
        cost_estimate=conv_cost,
    )(wmat, row_mask, col_mask, x_flat)

    # BatchNorm2d(1) training-mode batch stats from per-image partial sums (tiny).
    cnt = jnp.float32(N * HW)
    s_tot = jnp.sum(stats[:, 0, 0])
    ss_tot = jnp.sum(stats[:, 1, 0])
    mean = s_tot / cnt
    var = jnp.maximum(ss_tot / cnt - mean * mean, 0.0)
    g = gamma.astype(jnp.float32).reshape(())
    bt = beta.astype(jnp.float32).reshape(())
    a = g * lax.rsqrt(var + eps)
    b = bt - mean * a
    ab = jnp.stack([a, b])                                    # (2,) f32 -> SMEM

    # Stage 2: BN affine + sigmoid + gate; 2-D parallel grid (N, C tiles).
    Ct = _pick_c_tile(C, HW, itemsize)
    vmem2 = _vmem_limit_bytes(Ct * HW * itemsize, Ct * HW * itemsize, HW * 4)
    gate_cost = pl.CostEstimate(
        flops=N * HW * (C + 4),
        transcendentals=N * HW,
        bytes_accessed=2 * N * C * HW * itemsize + N * HW * 4,
    )
    out_flat = pl.pallas_call(
        _gate_kernel,
        out_shape=jax.ShapeDtypeStruct((N, C, HW), x.dtype),
        grid=(N, C // Ct),
        in_specs=[
            smem_spec,                                            # (a, b) BN affine
            pl.BlockSpec((1, 1, HW), lambda n, c: (n, 0, 0)),     # conv plane
            pl.BlockSpec((1, Ct, HW), lambda n, c: (n, c, 0)),    # x tile
        ],
        out_specs=pl.BlockSpec((1, Ct, HW), lambda n, c: (n, c, 0)),
        compiler_params=pltpu.CompilerParams(
            dimension_semantics=("parallel", "parallel"), vmem_limit_bytes=vmem2),
        cost_estimate=gate_cost,
    )(ab, conv_out, x_flat)

    return out_flat.reshape(N, C, H, W)


# --------------------------------------------------------------------------- #
# Pure-JAX reference.
# --------------------------------------------------------------------------- #
def _reference(x, conv_w, gamma, beta, eps=1e-5):
    K = conv_w.shape[-1]
    P = (K - 1) // 2
    avg = jnp.mean(x, axis=1, keepdims=True)
    mx = jnp.max(x, axis=1, keepdims=True)
    cat = jnp.concatenate([avg, mx], axis=1)
    conv = lax.conv_general_dilated(cat, conv_w, (1, 1), ((P, P), (P, P)),
                                    dimension_numbers=("NCHW", "OIHW", "NCHW"))
    mean = jnp.mean(conv)
    var = jnp.mean((conv - mean) ** 2)
    bn = (gamma.reshape(1, 1, 1, 1) * (conv - mean) / jnp.sqrt(var + eps)
          + beta.reshape(1, 1, 1, 1))
    return x * jax.nn.sigmoid(bn)


if __name__ == "__main__":
    key = jax.random.PRNGKey(0)
    kx_key, kw_key = jax.random.split(key)

    N, C, H, W = 2, 4, 16, 16
    x = jax.random.normal(kx_key, (N, C, H, W), jnp.float32)
    conv_w = jax.random.normal(kw_key, (1, 2, 7, 7), jnp.float32) * 0.1
    gamma = jnp.array([1.25], jnp.float32)   # deterministic BN affine params
    beta = jnp.array([-0.10], jnp.float32)

    ref = _reference(x, conv_w, gamma, beta)

    # Fused single-launch path (default for small shapes), MXU tap matmul.
    out = jax.block_until_ready(spatial_attention(x, conv_w, gamma, beta))
    assert out.shape == x.shape and out.dtype == x.dtype
    err = float(jnp.max(jnp.abs(out - ref)))
    assert err < 1e-4, f"fused path max abs err = {err}"

    # Fused path with the VPU tap fallback (v5e-friendly branch).
    out_vpu = jax.block_until_ready(
        spatial_attention(x, conv_w, gamma, beta, tap_matmul=False))
    err_vpu = float(jnp.max(jnp.abs(out_vpu - ref)))
    assert err_vpu < 1e-4, f"fused/VPU path max abs err = {err_vpu}"

    # Force the tiled two-stage path (used for large shapes) to verify it as well.
    out2 = jax.block_until_ready(
        spatial_attention(x, conv_w, gamma, beta, small_fuse_bytes=0))
    err2 = float(jnp.max(jnp.abs(out2 - ref)))
    assert err2 < 1e-4, f"two-stage path max abs err = {err2}"

    print("KERNEL_OK")
</pallas_src>

<mosaic_0001>
module attributes {stable_mosaic.version = 11 : i64} {
  func.func @_fused_kernel(%arg0: i32, %arg1: memref<2xf32, #tpu.memory_space<smem>>, %arg2: memref<8x16xf32, #tpu.memory_space<vmem>>, %arg3: memref<7x256xf32, #tpu.memory_space<vmem>>, %arg4: memref<7x256xf32, #tpu.memory_space<vmem>>, %arg5: memref<2x4x256xf32, #tpu.memory_space<vmem>>, %arg6: memref<2x4x256xf32, #tpu.memory_space<vmem>>) attributes {dimension_semantics = [#tpu.dimension_semantics<arbitrary>], iteration_bounds = array<i64: 1>, scalar_prefetch = 0 : i64, scratch_operands = 0 : i64, tpu.core_type = #tpu.core_type<tc>, window_params = [{transform_indices = @transform_0, window_bounds = array<i64: 2>}, {pipeline_mode = #tpu.pipeline_mode<synchronous>, transform_indices = @transform_1, window_bounds = array<i64: 8, 16>}, {pipeline_mode = #tpu.pipeline_mode<synchronous>, transform_indices = @transform_2, window_bounds = array<i64: 7, 256>}, {pipeline_mode = #tpu.pipeline_mode<synchronous>, transform_indices = @transform_3, window_bounds = array<i64: 7, 256>}, {pipeline_mode = #tpu.pipeline_mode<synchronous>, transform_indices = @transform_4, window_bounds = array<i64: 2, 4, 256>}, {pipeline_mode = #tpu.pipeline_mode<synchronous>, transform_indices = @transform_5, window_bounds = array<i64: 2, 4, 256>}]} {
    %c0 = arith.constant 0 : index
    %c0_0 = arith.constant 0 : index
    %0 = vector.load %arg2[%c0, %c0_0] : memref<8x16xf32, #tpu.memory_space<vmem>>, vector<8x16xf32>
    %c0_1 = arith.constant 0 : index
    %c0_2 = arith.constant 0 : index
    %1 = vector.load %arg3[%c0_1, %c0_2] : memref<7x256xf32, #tpu.memory_space<vmem>>, vector<7x256xf32>
    %c0_3 = arith.constant 0 : index
    %c0_4 = arith.constant 0 : index
    %2 = vector.load %arg4[%c0_3, %c0_4] : memref<7x256xf32, #tpu.memory_space<vmem>>, vector<7x256xf32>
    %c0_5 = arith.constant 0 : index
    %c0_6 = arith.constant 0 : index
    %c0_7 = arith.constant 0 : index
    %3 = vector.load %arg5[%c0_5, %c0_6, %c0_7] : memref<2x4x256xf32, #tpu.memory_space<vmem>>, vector<1x4x256xf32>
    %4 = vector.shape_cast %3 : vector<1x4x256xf32> to vector<4x256xf32>
    %cst = arith.constant dense<0.000000e+00> : vector<256xf32>
    %5 = vector.multi_reduction <add>, %4, %cst [0] : vector<4x256xf32> to vector<256xf32>
    %6 = vector.shape_cast %5 : vector<256xf32> to vector<1x256xf32>
    %cst_8 = arith.constant 4.000000e+00 : f32
    %7 = vector.broadcast %cst_8 : f32 to vector<1x256xf32>
    %8 = arith.divf %6, %7 : vector<1x256xf32>
    %cst_9 = arith.constant dense<0xFF800000> : vector<256xf32>
    %9 = vector.multi_reduction <maximumf>, %4, %cst_9 [0] : vector<4x256xf32> to vector<256xf32>
    %10 = vector.shape_cast %9 : vector<256xf32> to vector<1x256xf32>
    %11 = tpu.concatenate %8, %10 in 0 : vector<1x256xf32>, vector<1x256xf32> -> vector<2x256xf32>
    %c3_i32 = arith.constant 3 : i32
    %12 = tpu.dynamic_rotate %11 by %c3_i32 dim 1 : vector<2x256xf32>, i32 -> vector<2x256xf32>
    %13 = vector.extract_strided_slice %2 {offsets = [0, 0], sizes = [1, 256], strides = [1, 1]} : vector<7x256xf32> to vector<1x256xf32>
    %14 = vector.broadcast %13 : vector<1x256xf32> to vector<2x256xf32>
    %15 = arith.mulf %12, %14 : vector<2x256xf32>
    %c2_i32 = arith.constant 2 : i32
    %16 = tpu.dynamic_rotate %11 by %c2_i32 dim 1 : vector<2x256xf32>, i32 -> vector<2x256xf32>
    %17 = vector.extract_strided_slice %2 {offsets = [1, 0], sizes = [1, 256], strides = [1, 1]} : vector<7x256xf32> to vector<1x256xf32>
    %18 = vector.broadcast %17 : vector<1x256xf32> to vector<2x256xf32>
    %19 = arith.mulf %16, %18 : vector<2x256xf32>
    %c1_i32 = arith.constant 1 : i32
    %20 = tpu.dynamic_rotate %11 by %c1_i32 dim 1 : vector<2x256xf32>, i32 -> vector<2x256xf32>
    %21 = vector.extract_strided_slice %2 {offsets = [2, 0], sizes = [1, 256], strides = [1, 1]} : vector<7x256xf32> to vector<1x256xf32>
    %22 = vector.broadcast %21 : vector<1x256xf32> to vector<2x256xf32>
    %23 = arith.mulf %20, %22 : vector<2x256xf32>
    %24 = vector.extract_strided_slice %2 {offsets = [3, 0], sizes = [1, 256], strides = [1, 1]} : vector<7x256xf32> to vector<1x256xf32>
    %25 = vector.broadcast %24 : vector<1x256xf32> to vector<2x256xf32>
    %26 = arith.mulf %11, %25 : vector<2x256xf32>
    %c255_i32 = arith.constant 255 : i32
    %27 = tpu.dynamic_rotate %11 by %c255_i32 dim 1 : vector<2x256xf32>, i32 -> vector<2x256xf32>
    %28 = vector.extract_strided_slice %2 {offsets = [4, 0], sizes = [1, 256], strides = [1, 1]} : vector<7x256xf32> to vector<1x256xf32>
    %29 = vector.broadcast %28 : vector<1x256xf32> to vector<2x256xf32>
    %30 = arith.mulf %27, %29 : vector<2x256xf32>
    %c254_i32 = arith.constant 254 : i32
    %31 = tpu.dynamic_rotate %11 by %c254_i32 dim 1 : vector<2x256xf32>, i32 -> vector<2x256xf32>
    %32 = vector.extract_strided_slice %2 {offsets = [5, 0], sizes = [1, 256], strides = [1, 1]} : vector<7x256xf32> to vector<1x256xf32>
    %33 = vector.broadcast %32 : vector<1x256xf32> to vector<2x256xf32>
    %34 = arith.mulf %31, %33 : vector<2x256xf32>
    %c253_i32 = arith.constant 253 : i32
    %35 = tpu.dynamic_rotate %11 by %c253_i32 dim 1 : vector<2x256xf32>, i32 -> vector<2x256xf32>
    %36 = vector.extract_strided_slice %2 {offsets = [6, 0], sizes = [1, 256], strides = [1, 1]} : vector<7x256xf32> to vector<1x256xf32>
    %37 = vector.broadcast %36 : vector<1x256xf32> to vector<2x256xf32>
    %38 = arith.mulf %35, %37 : vector<2x256xf32>
    %39 = tpu.concatenate %15, %19, %23, %26, %30, %34, %38 in 0 : vector<2x256xf32>, vector<2x256xf32>, vector<2x256xf32>, vector<2x256xf32>, vector<2x256xf32>, vector<2x256xf32>, vector<2x256xf32> -> vector<14x256xf32>
    %cst_10 = arith.constant 0.000000e+00 : f32
    %40 = vector.broadcast %cst_10 : f32 to vector<2x256xf32>
    %41 = tpu.concatenate %39, %40 in 0 : vector<14x256xf32>, vector<2x256xf32> -> vector<16x256xf32>
    %cst_11 = arith.constant dense<0.000000e+00> : vector<8x256xf32>
    %42 = tpu.matmul %0, %41, %cst_11 {dimension_numbers = #tpu.dot_dimension_numbers<[1], [0], [0], [1], [0, 0, 1, 1], [], []>} : vector<8x16xf32>, vector<16x256xf32>, vector<8x256xf32> -> vector<8x256xf32>
    %cst_12 = arith.constant 0.000000e+00 : f32
    %43 = vector.broadcast %cst_12 : f32 to vector<1x256xf32>
    %44 = vector.extract_strided_slice %42 {offsets = [0, 0], sizes = [1, 256], strides = [1, 1]} : vector<8x256xf32> to vector<1x256xf32>
    %c48_i32 = arith.constant 48 : i32
    %45 = tpu.dynamic_rotate %44 by %c48_i32 dim 1 : vector<1x256xf32>, i32 -> vector<1x256xf32>
    %46 = vector.extract_strided_slice %1 {offsets = [0, 0], sizes = [1, 256], strides = [1, 1]} : vector<7x256xf32> to vector<1x256xf32>
    %47 = arith.mulf %45, %46 : vector<1x256xf32>
    %48 = arith.addf %43, %47 : vector<1x256xf32>
    %49 = vector.extract_strided_slice %42 {offsets = [1, 0], sizes = [1, 256], strides = [1, 1]} : vector<8x256xf32> to vector<1x256xf32>
    %c32_i32 = arith.constant 32 : i32
    %50 = tpu.dynamic_rotate %49 by %c32_i32 dim 1 : vector<1x256xf32>, i32 -> vector<1x256xf32>
    %51 = vector.extract_strided_slice %1 {offsets = [1, 0], sizes = [1, 256], strides = [1, 1]} : vector<7x256xf32> to vector<1x256xf32>
    %52 = arith.mulf %50, %51 : vector<1x256xf32>
    %53 = arith.addf %48, %52 : vector<1x256xf32>
    %54 = vector.extract_strided_slice %42 {offsets = [2, 0], sizes = [1, 256], strides = [1, 1]} : vector<8x256xf32> to vector<1x256xf32>
    %c16_i32 = arith.constant 16 : i32
    %55 = tpu.dynamic_rotate %54 by %c16_i32 dim 1 : vector<1x256xf32>, i32 -> vector<1x256xf32>
    %56 = vector.extract_strided_slice %1 {offsets = [2, 0], sizes = [1, 256], strides = [1, 1]} : vector<7x256xf32> to vector<1x256xf32>
    %57 = arith.mulf %55, %56 : vector<1x256xf32>
    %58 = arith.addf %53, %57 : vector<1x256xf32>
    %59 = vector.extract_strided_slice %42 {offsets = [3, 0], sizes = [1, 256], strides = [1, 1]} : vector<8x256xf32> to vector<1x256xf32>
    %60 = vector.extract_strided_slice %1 {offsets = [3, 0], sizes = [1, 256], strides = [1, 1]} : vector<7x256xf32> to vector<1x256xf32>
    %61 = arith.mulf %59, %60 : vector<1x256xf32>
    %62 = arith.addf %58, %61 : vector<1x256xf32>
    %63 = vector.extract_strided_slice %42 {offsets = [4, 0], sizes = [1, 256], strides = [1, 1]} : vector<8x256xf32> to vector<1x256xf32>
    %c240_i32 = arith.constant 240 : i32
    %64 = tpu.dynamic_rotate %63 by %c240_i32 dim 1 : vector<1x256xf32>, i32 -> vector<1x256xf32>
    %65 = vector.extract_strided_slice %1 {offsets = [4, 0], sizes = [1, 256], strides = [1, 1]} : vector<7x256xf32> to vector<1x256xf32>
    %66 = arith.mulf %64, %65 : vector<1x256xf32>
    %67 = arith.addf %62, %66 : vector<1x256xf32>
    %68 = vector.extract_strided_slice %42 {offsets = [5, 0], sizes = [1, 256], strides = [1, 1]} : vector<8x256xf32> to vector<1x256xf32>
    %c224_i32 = arith.constant 224 : i32
    %69 = tpu.dynamic_rotate %68 by %c224_i32 dim 1 : vector<1x256xf32>, i32 -> vector<1x256xf32>
    %70 = vector.extract_strided_slice %1 {offsets = [5, 0], sizes = [1, 256], strides = [1, 1]} : vector<7x256xf32> to vector<1x256xf32>
    %71 = arith.mulf %69, %70 : vector<1x256xf32>
    %72 = arith.addf %67, %71 : vector<1x256xf32>
    %73 = vector.extract_strided_slice %42 {offsets = [6, 0], sizes = [1, 256], strides = [1, 1]} : vector<8x256xf32> to vector<1x256xf32>
    %c208_i32 = arith.constant 208 : i32
    %74 = tpu.dynamic_rotate %73 by %c208_i32 dim 1 : vector<1x256xf32>, i32 -> vector<1x256xf32>
    %75 = vector.extract_strided_slice %1 {offsets = [6, 0], sizes = [1, 256], strides = [1, 1]} : vector<7x256xf32> to vector<1x256xf32>
    %76 = arith.mulf %74, %75 : vector<1x256xf32>
    %77 = arith.addf %72, %76 : vector<1x256xf32>
    %78 = vector.shape_cast %77 : vector<1x256xf32> to vector<1x1x256xf32>
    %cst_13 = arith.constant dense<0.000000e+00> : vector<1xf32>
    %79 = vector.multi_reduction <add>, %78, %cst_13 [1, 2] : vector<1x1x256xf32> to vector<1xf32>
    %80 = vector.shape_cast %79 : vector<1xf32> to vector<1x1x1xf32>
    %81 = vector.extract %80[0, 0, 0] : f32 from vector<1x1x1xf32>
    %cst_14 = arith.constant 0.000000e+00 : f32
    %82 = arith.addf %cst_14, %81 : f32
    %c1 = arith.constant 1 : index
    %c0_15 = arith.constant 0 : index
    %c0_16 = arith.constant 0 : index
    %83 = vector.load %arg5[%c1, %c0_15, %c0_16] : memref<2x4x256xf32, #tpu.memory_space<vmem>>, vector<1x4x256xf32>
    %84 = vector.shape_cast %83 : vector<1x4x256xf32> to vector<4x256xf32>
    %cst_17 = arith.constant dense<0.000000e+00> : vector<256xf32>
    %85 = vector.multi_reduction <add>, %84, %cst_17 [0] : vector<4x256xf32> to vector<256xf32>
    %86 = vector.shape_cast %85 : vector<256xf32> to vector<1x256xf32>
    %cst_18 = arith.constant 4.000000e+00 : f32
    %87 = vector.broadcast %cst_18 : f32 to vector<1x256xf32>
    %88 = arith.divf %86, %87 : vector<1x256xf32>
    %cst_19 = arith.constant dense<0xFF800000> : vector<256xf32>
    %89 = vector.multi_reduction <maximumf>, %84, %cst_19 [0] : vector<4x256xf32> to vector<256xf32>
    %90 = vector.shape_cast %89 : vector<256xf32> to vector<1x256xf32>
    %91 = tpu.concatenate %88, %90 in 0 : vector<1x256xf32>, vector<1x256xf32> -> vector<2x256xf32>
    %c3_i32_20 = arith.constant 3 : i32
    %92 = tpu.dynamic_rotate %91 by %c3_i32_20 dim 1 : vector<2x256xf32>, i32 -> vector<2x256xf32>
    %93 = vector.extract_strided_slice %2 {offsets = [0, 0], sizes = [1, 256], strides = [1, 1]} : vector<7x256xf32> to vector<1x256xf32>
    %94 = vector.broadcast %93 : vector<1x256xf32> to vector<2x256xf32>
    %95 = arith.mulf %92, %94 : vector<2x256xf32>
    %c2_i32_21 = arith.constant 2 : i32
    %96 = tpu.dynamic_rotate %91 by %c2_i32_21 dim 1 : vector<2x256xf32>, i32 -> vector<2x256xf32>
    %97 = vector.extract_strided_slice %2 {offsets = [1, 0], sizes = [1, 256], strides = [1, 1]} : vector<7x256xf32> to vector<1x256xf32>
    %98 = vector.broadcast %97 : vector<1x256xf32> to vector<2x256xf32>
    %99 = arith.mulf %96, %98 : vector<2x256xf32>
    %c1_i32_22 = arith.constant 1 : i32
    %100 = tpu.dynamic_rotate %91 by %c1_i32_22 dim 1 : vector<2x256xf32>, i32 -> vector<2x256xf32>
    %101 = vector.extract_strided_slice %2 {offsets = [2, 0], sizes = [1, 256], strides = [1, 1]} : vector<7x256xf32> to vector<1x256xf32>
    %102 = vector.broadcast %101 : vector<1x256xf32> to vector<2x256xf32>
    %103 = arith.mulf %100, %102 : vector<2x256xf32>
    %104 = vector.extract_strided_slice %2 {offsets = [3, 0], sizes = [1, 256], strides = [1, 1]} : vector<7x256xf32> to vector<1x256xf32>
    %105 = vector.broadcast %104 : vector<1x256xf32> to vector<2x256xf32>
    %106 = arith.mulf %91, %105 : vector<2x256xf32>
    %c255_i32_23 = arith.constant 255 : i32
    %107 = tpu.dynamic_rotate %91 by %c255_i32_23 dim 1 : vector<2x256xf32>, i32 -> vector<2x256xf32>
    %108 = vector.extract_strided_slice %2 {offsets = [4, 0], sizes = [1, 256], strides = [1, 1]} : vector<7x256xf32> to vector<1x256xf32>
    %109 = vector.broadcast %108 : vector<1x256xf32> to vector<2x256xf32>
    %110 = arith.mulf %107, %109 : vector<2x256xf32>
    %c254_i32_24 = arith.constant 254 : i32
    %111 = tpu.dynamic_rotate %91 by %c254_i32_24 dim 1 : vector<2x256xf32>, i32 -> vector<2x256xf32>
    %112 = vector.extract_strided_slice %2 {offsets = [5, 0], sizes = [1, 256], strides = [1, 1]} : vector<7x256xf32> to vector<1x256xf32>
    %113 = vector.broadcast %112 : vector<1x256xf32> to vector<2x256xf32>
    %114 = arith.mulf %111, %113 : vector<2x256xf32>
    %c253_i32_25 = arith.constant 253 : i32
    %115 = tpu.dynamic_rotate %91 by %c253_i32_25 dim 1 : vector<2x256xf32>, i32 -> vector<2x256xf32>
    %116 = vector.extract_strided_slice %2 {offsets = [6, 0], sizes = [1, 256], strides = [1, 1]} : vector<7x256xf32> to vector<1x256xf32>
    %117 = vector.broadcast %116 : vector<1x256xf32> to vector<2x256xf32>
    %118 = arith.mulf %115, %117 : vector<2x256xf32>
    %119 = tpu.concatenate %95, %99, %103, %106, %110, %114, %118 in 0 : vector<2x256xf32>, vector<2x256xf32>, vector<2x256xf32>, vector<2x256xf32>, vector<2x256xf32>, vector<2x256xf32>, vector<2x256xf32> -> vector<14x256xf32>
    %cst_26 = arith.constant 0.000000e+00 : f32
    %120 = vector.broadcast %cst_26 : f32 to vector<2x256xf32>
    %121 = tpu.concatenate %119, %120 in 0 : vector<14x256xf32>, vector<2x256xf32> -> vector<16x256xf32>
    %cst_27 = arith.constant dense<0.000000e+00> : vector<8x256xf32>
    %122 = tpu.matmul %0, %121, %cst_27 {dimension_numbers = #tpu.dot_dimension_numbers<[1], [0], [0], [1], [0, 0, 1, 1], [], []>} : vector<8x16xf32>, vector<16x256xf32>, vector<8x256xf32> -> vector<8x256xf32>
    %cst_28 = arith.constant 0.000000e+00 : f32
    %123 = vector.broadcast %cst_28 : f32 to vector<1x256xf32>
    %124 = vector.extract_strided_slice %122 {offsets = [0, 0], sizes = [1, 256], strides = [1, 1]} : vector<8x256xf32> to vector<1x256xf32>
    %c48_i32_29 = arith.constant 48 : i32
    %125 = tpu.dynamic_rotate %124 by %c48_i32_29 dim 1 : vector<1x256xf32>, i32 -> vector<1x256xf32>
    %126 = vector.extract_strided_slice %1 {offsets = [0, 0], sizes = [1, 256], strides = [1, 1]} : vector<7x256xf32> to vector<1x256xf32>
    %127 = arith.mulf %125, %126 : vector<1x256xf32>
    %128 = arith.addf %123, %127 : vector<1x256xf32>
    %129 = vector.extract_strided_slice %122 {offsets = [1, 0], sizes = [1, 256], strides = [1, 1]} : vector<8x256xf32> to vector<1x256xf32>
    %c32_i32_30 = arith.constant 32 : i32
    %130 = tpu.dynamic_rotate %129 by %c32_i32_30 dim 1 : vector<1x256xf32>, i32 -> vector<1x256xf32>
    %131 = vector.extract_strided_slice %1 {offsets = [1, 0], sizes = [1, 256], strides = [1, 1]} : vector<7x256xf32> to vector<1x256xf32>
    %132 = arith.mulf %130, %131 : vector<1x256xf32>
    %133 = arith.addf %128, %132 : vector<1x256xf32>
    %134 = vector.extract_strided_slice %122 {offsets = [2, 0], sizes = [1, 256], strides = [1, 1]} : vector<8x256xf32> to vector<1x256xf32>
    %c16_i32_31 = arith.constant 16 : i32
    %135 = tpu.dynamic_rotate %134 by %c16_i32_31 dim 1 : vector<1x256xf32>, i32 -> vector<1x256xf32>
    %136 = vector.extract_strided_slice %1 {offsets = [2, 0], sizes = [1, 256], strides = [1, 1]} : vector<7x256xf32> to vector<1x256xf32>
    %137 = arith.mulf %135, %136 : vector<1x256xf32>
    %138 = arith.addf %133, %137 : vector<1x256xf32>
    %139 = vector.extract_strided_slice %122 {offsets = [3, 0], sizes = [1, 256], strides = [1, 1]} : vector<8x256xf32> to vector<1x256xf32>
    %140 = vector.extract_strided_slice %1 {offsets = [3, 0], sizes = [1, 256], strides = [1, 1]} : vector<7x256xf32> to vector<1x256xf32>
    %141 = arith.mulf %139, %140 : vector<1x256xf32>
    %142 = arith.addf %138, %141 : vector<1x256xf32>
    %143 = vector.extract_strided_slice %122 {offsets = [4, 0], sizes = [1, 256], strides = [1, 1]} : vector<8x256xf32> to vector<1x256xf32>
    %c240_i32_32 = arith.constant 240 : i32
    %144 = tpu.dynamic_rotate %143 by %c240_i32_32 dim 1 : vector<1x256xf32>, i32 -> vector<1x256xf32>
    %145 = vector.extract_strided_slice %1 {offsets = [4, 0], sizes = [1, 256], strides = [1, 1]} : vector<7x256xf32> to vector<1x256xf32>
    %146 = arith.mulf %144, %145 : vector<1x256xf32>
    %147 = arith.addf %142, %146 : vector<1x256xf32>
    %148 = vector.extract_strided_slice %122 {offsets = [5, 0], sizes = [1, 256], strides = [1, 1]} : vector<8x256xf32> to vector<1x256xf32>
    %c224_i32_33 = arith.constant 224 : i32
    %149 = tpu.dynamic_rotate %148 by %c224_i32_33 dim 1 : vector<1x256xf32>, i32 -> vector<1x256xf32>
    %150 = vector.extract_strided_slice %1 {offsets = [5, 0], sizes = [1, 256], strides = [1, 1]} : vector<7x256xf32> to vector<1x256xf32>
    %151 = arith.mulf %149, %150 : vector<1x256xf32>
    %152 = arith.addf %147, %151 : vector<1x256xf32>
    %153 = vector.extract_strided_slice %122 {offsets = [6, 0], sizes = [1, 256], strides = [1, 1]} : vector<8x256xf32> to vector<1x256xf32>
    %c208_i32_34 = arith.constant 208 : i32
    %154 = tpu.dynamic_rotate %153 by %c208_i32_34 dim 1 : vector<1x256xf32>, i32 -> vector<1x256xf32>
    %155 = vector.extract_strided_slice %1 {offsets = [6, 0], sizes = [1, 256], strides = [1, 1]} : vector<7x256xf32> to vector<1x256xf32>
    %156 = arith.mulf %154, %155 : vector<1x256xf32>
    %157 = arith.addf %152, %156 : vector<1x256xf32>
    %158 = vector.shape_cast %157 : vector<1x256xf32> to vector<1x1x256xf32>
    %cst_35 = arith.constant dense<0.000000e+00> : vector<1xf32>
    %159 = vector.multi_reduction <add>, %158, %cst_35 [1, 2] : vector<1x1x256xf32> to vector<1xf32>
    %160 = vector.shape_cast %159 : vector<1xf32> to vector<1x1x1xf32>
    %161 = vector.extract %160[0, 0, 0] : f32 from vector<1x1x1xf32>
    %162 = arith.addf %82, %161 : f32
    %cst_36 = arith.constant 5.120000e+02 : f32
    %163 = arith.divf %162, %cst_36 : f32
    %164 = vector.broadcast %163 : f32 to vector<1x256xf32>
    %165 = arith.subf %77, %164 : vector<1x256xf32>
    %166 = arith.mulf %165, %165 : vector<1x256xf32>
    %167 = vector.shape_cast %166 : vector<1x256xf32> to vector<1x1x256xf32>
    %cst_37 = arith.constant dense<0.000000e+00> : vector<1xf32>
    %168 = vector.multi_reduction <add>, %167, %cst_37 [1, 2] : vector<1x1x256xf32> to vector<1xf32>
    %169 = vector.shape_cast %168 : vector<1xf32> to vector<1x1x1xf32>
    %170 = vector.extract %169[0, 0, 0] : f32 from vector<1x1x1xf32>
    %cst_38 = arith.constant 0.000000e+00 : f32
    %171 = arith.addf %cst_38, %170 : f32
    %172 = vector.broadcast %163 : f32 to vector<1x256xf32>
    %173 = arith.subf %157, %172 : vector<1x256xf32>
    %174 = arith.mulf %173, %173 : vector<1x256xf32>
    %175 = vector.shape_cast %174 : vector<1x256xf32> to vector<1x1x256xf32>
    %cst_39 = arith.constant dense<0.000000e+00> : vector<1xf32>
    %176 = vector.multi_reduction <add>, %175, %cst_39 [1, 2] : vector<1x1x256xf32> to vector<1xf32>
    %177 = vector.shape_cast %176 : vector<1xf32> to vector<1x1x1xf32>
    %178 = vector.extract %177[0, 0, 0] : f32 from vector<1x1x1xf32>
    %179 = arith.addf %171, %178 : f32
    %cst_40 = arith.constant 5.120000e+02 : f32
    %180 = arith.divf %179, %cst_40 : f32
    %c0_41 = arith.constant 0 : index
    %181 = memref.load %arg1[%c0_41] : memref<2xf32, #tpu.memory_space<smem>>
    %cst_42 = arith.constant 9.99999974E-6 : f32
    %182 = arith.addf %180, %cst_42 : f32
    %183 = math.rsqrt %182 : f32
    %184 = arith.mulf %181, %183 : f32
    %c1_43 = arith.constant 1 : index
    %185 = memref.load %arg1[%c1_43] : memref<2xf32, #tpu.memory_space<smem>>
    %186 = arith.mulf %163, %184 : f32
    %187 = arith.subf %185, %186 : f32
    %188 = vector.broadcast %184 : f32 to vector<1x256xf32>
    %189 = arith.mulf %77, %188 : vector<1x256xf32>
    %190 = vector.broadcast %187 : f32 to vector<1x256xf32>
    %191 = arith.addf %189, %190 : vector<1x256xf32>
    %cst_44 = arith.constant 5.000000e-01 : f32
    %192 = vector.broadcast %cst_44 : f32 to vector<1x256xf32>
    %193 = arith.mulf %192, %191 : vector<1x256xf32>
    %194 = math.tanh %193 : vector<1x256xf32>
    %cst_45 = arith.constant 1.000000e+00 : f32
    %195 = vector.broadcast %cst_45 : f32 to vector<1x256xf32>
    %196 = arith.addf %194, %195 : vector<1x256xf32>
    %cst_46 = arith.constant 5.000000e-01 : f32
    %197 = vector.broadcast %cst_46 : f32 to vector<1x256xf32>
    %198 = arith.mulf %197, %196 : vector<1x256xf32>
    %c0_47 = arith.constant 0 : index
    %c0_48 = arith.constant 0 : index
    %c0_49 = arith.constant 0 : index
    %199 = vector.load %arg5[%c0_47, %c0_48, %c0_49] : memref<2x4x256xf32, #tpu.memory_space<vmem>>, vector<1x4x256xf32>
    %200 = vector.shape_cast %199 : vector<1x4x256xf32> to vector<4x256xf32>
    %201 = vector.broadcast %198 : vector<1x256xf32> to vector<4x256xf32>
    %202 = arith.mulf %200, %201 : vector<4x256xf32>
    %c0_50 = arith.constant 0 : index
    %c0_51 = arith.constant 0 : index
    %c0_52 = arith.constant 0 : index
    %203 = vector.load %arg6[%c0_50, %c0_51, %c0_52] : memref<2x4x256xf32, #tpu.memory_space<vmem>>, vector<1x4x256xf32>
    %204 = vector.shape_cast %203 : vector<1x4x256xf32> to vector<4x256xf32>
    %205 = vector.shape_cast %202 : vector<4x256xf32> to vector<1x4x256xf32>
    tpu.vector_store %arg6[%c0_50, %c0_51, %c0_52], %205 {strides = array<i32>} : memref<2x4x256xf32, #tpu.memory_space<vmem>>, vector<1x4x256xf32>,
    %206 = vector.broadcast %184 : f32 to vector<1x256xf32>
    %207 = arith.mulf %157, %206 : vector<1x256xf32>
    %208 = vector.broadcast %187 : f32 to vector<1x256xf32>
    %209 = arith.addf %207, %208 : vector<1x256xf32>
    %cst_53 = arith.constant 5.000000e-01 : f32
    %210 = vector.broadcast %cst_53 : f32 to vector<1x256xf32>
    %211 = arith.mulf %210, %209 : vector<1x256xf32>
    %212 = math.tanh %211 : vector<1x256xf32>
    %cst_54 = arith.constant 1.000000e+00 : f32
    %213 = vector.broadcast %cst_54 : f32 to vector<1x256xf32>
    %214 = arith.addf %212, %213 : vector<1x256xf32>
    %cst_55 = arith.constant 5.000000e-01 : f32
    %215 = vector.broadcast %cst_55 : f32 to vector<1x256xf32>
    %216 = arith.mulf %215, %214 : vector<1x256xf32>
    %c1_56 = arith.constant 1 : index
    %c0_57 = arith.constant 0 : index
    %c0_58 = arith.constant 0 : index
    %217 = vector.load %arg5[%c1_56, %c0_57, %c0_58] : memref<2x4x256xf32, #tpu.memory_space<vmem>>, vector<1x4x256xf32>
    %218 = vector.shape_cast %217 : vector<1x4x256xf32> to vector<4x256xf32>
    %219 = vector.broadcast %216 : vector<1x256xf32> to vector<4x256xf32>
    %220 = arith.mulf %218, %219 : vector<4x256xf32>
    %c1_59 = arith.constant 1 : index
    %c0_60 = arith.constant 0 : index
    %c0_61 = arith.constant 0 : index
    %221 = vector.load %arg6[%c1_59, %c0_60, %c0_61] : memref<2x4x256xf32, #tpu.memory_space<vmem>>, vector<1x4x256xf32>
    %222 = vector.shape_cast %221 : vector<1x4x256xf32> to vector<4x256xf32>
    %223 = vector.shape_cast %220 : vector<4x256xf32> to vector<1x4x256xf32>
    tpu.vector_store %arg6[%c1_59, %c0_60, %c0_61], %223 {strides = array<i32>} : memref<2x4x256xf32, #tpu.memory_space<vmem>>, vector<1x4x256xf32>,
    return
  }
  func.func @transform_0(%arg0: i32) -> i32 {
    %c0_i32 = arith.constant 0 : i32
    %c0_i32_0 = arith.constant 0 : i32
    return %c0_i32 : i32
  }
  func.func @transform_1(%arg0: i32) -> (i32, i32) {
    %c0_i32 = arith.constant 0 : i32
    %c0_i32_0 = arith.constant 0 : i32
    %c0_i32_1 = arith.constant 0 : i32
    return %c0_i32, %c0_i32_0 : i32, i32
  }
  func.func @transform_2(%arg0: i32) -> (i32, i32) {
    %c0_i32 = arith.constant 0 : i32
    %c0_i32_0 = arith.constant 0 : i32
    %c0_i32_1 = arith.constant 0 : i32
    return %c0_i32, %c0_i32_0 : i32, i32
  }
  func.func @transform_3(%arg0: i32) -> (i32, i32) {
    %c0_i32 = arith.constant 0 : i32
    %c0_i32_0 = arith.constant 0 : i32
    %c0_i32_1 = arith.constant 0 : i32
    return %c0_i32, %c0_i32_0 : i32, i32
  }
  func.func @transform_4(%arg0: i32) -> (i32, i32, i32) {
    %c0_i32 = arith.constant 0 : i32
    %c0_i32_0 = arith.constant 0 : i32
    %c0_i32_1 = arith.constant 0 : i32
    %c0_i32_2 = arith.constant 0 : i32
    return %c0_i32, %c0_i32_0, %c0_i32_1 : i32, i32, i32
  }
  func.func @transform_5(%arg0: i32) -> (i32, i32, i32) {
    %c0_i32 = arith.constant 0 : i32
    %c0_i32_0 = arith.constant 0 : i32
    %c0_i32_1 = arith.constant 0 : i32
    %c0_i32_2 = arith.constant 0 : i32
    return %c0_i32, %c0_i32_0, %c0_i32_1 : i32, i32, i32
  }
}

</mosaic_0001>

<bundles_post_ra>
// kernel: tpu_custom_call.1
= control target key start
LH: loop header
LB: loop body
LE: loop exit
PB: predicated region body
PF: predicated region fallthrough
CT: control target
= control target key end

     0   :  { %10 = vsyncpa [#allocation5], 0  ;;  %s1568_s0 = inlined_call_operand.hbm [shape: f32[2], index: 0, kind: input, shape index: {}]   ;;  %s1569_s1 = inlined_call_operand.hbm [shape: f32[8,16], index: 1, kind: input, shape index: {}]   ;;  %s1570_s2 = inlined_call_operand.hbm [shape: f32[7,256], index: 2, kind: input, shape index: {}]   ;;  %s1571_s3 = inlined_call_operand.hbm [shape: f32[7,256], index: 3, kind: input, shape index: {}]   ;;  %s1572_s4 = inlined_call_operand.hbm [shape: f32[2,4,256], index: 4, kind: input, shape index: {}]   ;;  %s1573_s5 = inlined_call_operand.hbm [shape: f32[2,4,256], index: 5, kind: output, shape index: {}]  }
   0x1   :  { %11 = vsyncpa [#allocation3], 0 }
   0x2   :  { %12 = vsyncpa [#allocation8], 0 }
   0x3   :  { %13 = vsyncpa [#allocation11], 0 }
   0x4   :  { %14 = vsyncpa [#allocation4], 0  ;;  %s1116_s18 = smov [#allocation7]   ;;  %s1117_s20 = smov [#allocation6]  }
   0x5   :  { %s39_s19 = sshll.u32 %s1116_s18, 4  ;;  %s29_s21 = sshll.u32 %s1117_s20, 4  ;;  %s40_s19 = int_to_ptr.vmem [resolvable:$true] %s39_s19  ;;  %s30_s21 = int_to_ptr.vmem [resolvable:$true] %s29_s21 }
   0x6   :  { %s986_s24 = scalar_lea.hbm %s1570_s2, 256 }
   0x7   :  { %p987_p0 = scmp.ne.s32.totalorder %s1570_s2, %s986_s24  ;;  %p990_p1 = scmp.lt.u32.totalorder %s986_s24, %s1570_s2 }
   0x9   :  { %p992_p2 = pnand %p990_p1, %p987_p0 }
   0xb   :  { %995 = shalt.err (!%p992_p2)
}
   0xc   :  { %s996_s29 = scalar_lea.vmem %s40_s19, 256  ;;  %p1001_p4 = scmp.lt.s32.totalorder %s40_s19, %s40_s19 }
   0xd   :  { %p997_p3 = scmp.ne.s32.totalorder %s40_s19, %s996_s29  ;;  %p1002_p5 = scmp.lt.s32.totalorder %s996_s29, %s996_s29 }
   0xf   :  { %p1003_p6 = por %p1002_p5, %p1001_p4 }
  0x11   :  { %p1004_p7 = pnand %p1003_p6, %p997_p3 }
  0x13   :  { %1007 = shalt.err (!%p1004_p7)
}
  0x14   :  { %42 = dma.hbm_to_vmem [thread:$0]  %s1570_s2, 256, %s40_s19, [#allocation8]  }
  0x15   :  { %s1008_s9 = scalar_lea.hbm %s1568_s0, 16 }
  0x16   :  { %p1009_p8 = scmp.ne.s32.totalorder %s1568_s0, %s1008_s9  ;;  %p1012_p9 = scmp.lt.u32.totalorder %s1008_s9, %s1568_s0 }
  0x18   :  { %p1014_p10 = pnand %p1012_p9, %p1009_p8 }
  0x1a   :  { %1017 = shalt.err (!%p1014_p10)
}
  0x1b   :  { %s1118_s14 = smov [#allocation2]   ;;  %s1018_s18 = scalar_lea.hbm %s1569_s1, 128 }
  0x1c   :  { %22 = dma.hbm_to_smem %s1568_s0, 16, %s1118_s14, [#allocation5]  }
  0x1d   :  { %p1019_p11 = scmp.ne.s32.totalorder %s1569_s1, %s1018_s18  ;;  %p1022_p12 = scmp.lt.u32.totalorder %s1018_s18, %s1569_s1 }
  0x1f   :  { %p1024_p13 = pnand %p1022_p12, %p1019_p11 }
  0x21   :  { %1027 = shalt.err (!%p1024_p13)
}
  0x22   :  { %s1028_s24 = scalar_lea.vmem %s30_s21, 128  ;;  %p1033_p1 = scmp.lt.s32.totalorder %s30_s21, %s30_s21 }
  0x23   :  { %p1029_p0 = scmp.ne.s32.totalorder %s30_s21, %s1028_s24  ;;  %p1034_p2 = scmp.lt.s32.totalorder %s1028_s24, %s1028_s24 }
  0x25   :  { %p1035_p3 = por %p1034_p2, %p1033_p1 }
  0x27   :  { %p1036_p4 = pnand %p1035_p3, %p1029_p0 }
  0x29   :  { %1039 = shalt.err (!%p1036_p4)
}
  0x2a   :  { %32 = dma.hbm_to_vmem [thread:$0]  %s1569_s1, 128, %s30_s21, [#allocation3]  }
  0x2b   :  { %s1119_s26 = smov [#allocation9]   ;;  %s1120_s28 = smov [#allocation10]  }
  0x2c   :  { %s49_s27 = sshll.u32 %s1119_s26, 4  ;;  %s58_s29 = sshll.u32 %s1120_s28, 4  ;;  %s50_s27 = int_to_ptr.vmem [resolvable:$true] %s49_s27  ;;  %s59_s29 = int_to_ptr.vmem [resolvable:$true] %s58_s29 }
  0x2d   :  { %s1040_s7 = scalar_lea.hbm %s1571_s3, 256 }
  0x2e   :  { %p1041_p5 = scmp.ne.s32.totalorder %s1571_s3, %s1040_s7  ;;  %p1044_p6 = scmp.lt.u32.totalorder %s1040_s7, %s1571_s3 }
  0x30   :  { %p1046_p7 = pnand %p1044_p6, %p1041_p5 }
  0x32   :  { %1049 = shalt.err (!%p1046_p7)
}
  0x33   :  { %s1050_s1 = scalar_lea.vmem %s50_s27, 256  ;;  %p1055_p9 = scmp.lt.s32.totalorder %s50_s27, %s50_s27 }
  0x34   :  { %p1051_p8 = scmp.ne.s32.totalorder %s50_s27, %s1050_s1  ;;  %p1056_p10 = scmp.lt.s32.totalorder %s1050_s1, %s1050_s1 }
  0x36   :  { %p1057_p11 = por %p1056_p10, %p1055_p9 }
  0x38   :  { %p1058_p12 = pnand %p1057_p11, %p1051_p8 }
  0x3a   :  { %1061 = shalt.err (!%p1058_p12)
}
  0x3b   :  { %52 = dma.hbm_to_vmem [thread:$0]  %s1571_s3, 256, %s50_s27, [#allocation8]  }
  0x3c   :  { %s1062_s15 = scalar_lea.hbm %s1572_s4, 256 }
  0x3d   :  { %p1063_p13 = scmp.ne.s32.totalorder %s1572_s4, %s1062_s15  ;;  %p1066_p0 = scmp.lt.u32.totalorder %s1062_s15, %s1572_s4 }
  0x3f   :  { %p1068_p1 = pnand %p1066_p0, %p1063_p13 }
  0x41   :  { %1071 = shalt.err (!%p1068_p1)
}
  0x42   :  { %s1072_s19 = scalar_lea.vmem %s59_s29, 256  ;;  %p1077_p3 = scmp.lt.s32.totalorder %s59_s29, %s59_s29 }
  0x43   :  { %p1073_p2 = scmp.ne.s32.totalorder %s59_s29, %s1072_s19  ;;  %p1078_p4 = scmp.lt.s32.totalorder %s1072_s19, %s1072_s19 }
  0x45   :  { %p1079_p5 = por %p1078_p4, %p1077_p3 }
  0x47   :  { %p1080_p6 = pnand %p1079_p5, %p1073_p2 }
  0x49   :  { %1083 = shalt.err (!%p1080_p6)
}
  0x4a   :  { %s1121_s3 = smov 128   ;;  %s1122_s20 = smov 8  }
  0x4b   :  { %64 = dma.hbm_to_vmem [thread:$0]  %s1572_s4, 256, %s59_s29, [#allocation11], %s1121_s3, %s1121_s3, %s1122_s20  }
  0x4c   :  { %1106 = dma.done.wait [#allocation5], 16  }
  0x4d   :  { %1107 = vsyncadd [#allocation5], 4294967280 }
  0x4e   :  { %1108 = dma.done.wait [#allocation3], 128  }
  0x4f   :  { %1109 = vsyncadd [#allocation3], 4294967168 }
  0x50   :  { %1110 = dma.done.wait [#allocation8], 512  }
  0x51   :  { %1111 = vsyncadd [#allocation8], 4294966784 }
  0x52   :  { %1112 = dma.done.wait [#allocation11], 256  }
  0x53   :  { %1113 = vsyncadd [#allocation11], 4294967040 }
  0x54   :  { %80 = sfence }
  0x55   :  { %vm90_vm0 = vcmask 1043456   ;;  %v492_v0 = vld [vmem:[#allocation10 + $0x8] sm:$0xff]  ;;  %v86_v1 = vld [vmem:[#allocation10] sm:$0xff]  ;;  %vm122_vm1 = vcmask 1040384   ;;  %s1123_s4 = smov 2   ;;  %s1124_s24 = smov 1  }
  0x56   :  { %v496_v2 = vsel %vm90_vm0, %v492_v0, 0.0  ;;  %v512_v3 = vsel %vm90_vm0, %v492_v0, -inf  ;;  %v91_v4 = vsel %vm90_vm0, %v86_v1, 0.0  ;;  %v108_v5 = vsel %vm90_vm0, %v86_v1, -inf  ;;  %s1125_s0 = smov 126   ;;  %s1126_s25 = smov 3  }
  0x57   :  { %v497_v6 = vrot.slane %v496_v2, 4  ;;  %v513_v7 = vrot.slane %v512_v3, 4  ;;  %v92_v8 = vrot.slane %v91_v4, 4  ;;  %v109_v9 = vrot.slane %v108_v5, 4  ;;  %s1127_s26 = smov 125   ;;  %s1129_s27 = smov 127  }
  0x58   :  { %v494_v10 = vcombine.high %v492_v0, %v492_v0  ;;  %v88_v11 = vcombine.high %v86_v1, %v86_v1  ;;  %vm269_vm6 = vcmask 1041408   ;;  %vm274_vm9 = vcmask 1045504   ;;  %s1131_s28 = smov 48   ;;  %s1132_s29 = smov 32  }
  0x59   :  { %v498_v12 = vadd.f32 %v497_v6, %v496_v2  ;;  %v514_v13 = vmax.f32 %v512_v3, %v513_v7  ;;  %v93_v14 = vadd.f32 %v92_v8, %v91_v4  ;;  %v110_v15 = vmax.f32 %v108_v5, %v109_v9  ;;  %s1133_s30 = smov 16   ;;  %s1134_s6 = smov 112  }
  0x5a   :  { %v503_v16 = vsel %vm90_vm0, %v494_v10, 0.0  ;;  %v519_v17 = vsel %vm90_vm0, %v494_v10, -inf  ;;  %v98_v18 = vsel %vm90_vm0, %v88_v11, 0.0  ;;  %v115_v19 = vsel %vm90_vm0, %v88_v11, -inf  ;;  %s1135_s7 = smov 96   ;;  %s1136_s8 = smov 80  }
  0x5b   :  { %v499_v20 = vrot.slane %v498_v12, 2  ;;  %v515_v21 = vrot.slane %v514_v13, 2  ;;  %v94_v22 = vrot.slane %v93_v14, 2  ;;  %v111_v23 = vrot.slane %v110_v15, 2  ;;  %s837_s16 = sld [smem:[#allocation2]]  ;;  %s928_s2 = sld [smem:[#allocation2 + $0x1]] }
  0x5c   :  { %v504_v24 = vrot.slane %v503_v16, 4  ;;  %v520_v25 = vrot.slane %v519_v17, 4  ;;  %v99_v26 = vrot.slane %v98_v18, 4  ;;  %v116_v27 = vrot.slane %v115_v19, 4  ;;  %s1137_s23 = smov [#allocation12]  }
  0x5d   :  { %v500_v28 = vadd.f32 %v499_v20, %v498_v12  ;;  %v516_v29 = vmax.f32 %v514_v13, %v515_v21  ;;  %v95_v30 = vadd.f32 %v94_v22, %v93_v14  ;;  %v112_v31 = vmax.f32 %v110_v15, %v111_v23  ;;  %v84_v20 = vld [vmem:[#allocation9] sm:$0x7f]  ;;  %v85_v21 = vld [vmem:[#allocation9 + $0x8] sm:$0x7f] }
  0x5e   :  { %v505_v32 = vadd.f32 %v504_v24, %v503_v16  ;;  %v521_v33 = vmax.f32 %v519_v17, %v520_v25  ;;  %v100_v34 = vadd.f32 %v99_v26, %v98_v18  ;;  %v117_v35 = vmax.f32 %v115_v19, %v116_v27 }
  0x5f   :  { %v501_v36 = vrot.slane %v500_v28, 1  ;;  %v517_v37 = vrot.slane %v516_v29, 1  ;;  %v96_v38 = vrot.slane %v95_v30, 1  ;;  %v113_v39 = vrot.slane %v112_v31, 1 }
  0x60   :  { %v506_v40 = vrot.slane %v505_v32, 2  ;;  %v522_v41 = vrot.slane %v521_v33, 2  ;;  %v101_v42 = vrot.slane %v100_v34, 2  ;;  %v118_v43 = vrot.slane %v117_v35, 2 }
  0x61   :  { %v502_v44 = vadd.f32 %v501_v36, %v500_v28  ;;  %v518_v45 = vmax.f32 %v516_v29, %v517_v37  ;;  %v97_v46 = vadd.f32 %v96_v38, %v95_v30  ;;  %v114_v47 = vmax.f32 %v112_v31, %v113_v39 }
  0x62   :  { %v507_v48 = vadd.f32 %v506_v40, %v505_v32  ;;  %v523_v49 = vmax.f32 %v521_v33, %v522_v41  ;;  %v102_v50 = vadd.f32 %v101_v42, %v100_v34  ;;  %v119_v51 = vmax.f32 %v117_v35, %v118_v43 }
  0x63   :  { %v510_v52 = vmul.f32 0.25, %v502_v44  ;;  %v106_v53 = vmul.f32 0.25, %v97_v46  ;;  %v1128_v4 = vmov 0.0   ;;  %v129_v10 = vlaneseq }
  0x64   :  { %v508_v54 = vrot.slane %v507_v48, 1  ;;  %v524_v55 = vrot.slane %v523_v49, 1  ;;  %v103_v56 = vrot.slane %v102_v50, 1  ;;  %v120_v57 = vrot.slane %v119_v51, 1  ;;  %351 = vmatprep.mubr.f32.mxu0 %v1128_v4  ;;  %684 = vmatprep.mubr.f32.mxu1 %v1128_v4 }
  0x65   :  { %v1240_v58 = vsel %vm122_vm1, %v510_v52, %v518_v45  ;;  %v1243_v59 = vsel %vm122_vm1, %v106_v53, %v114_v47  ;;  %v135_v13 = vshrl.u32 %v129_v10, 7  ;;  %v1267_v17 = vand.u32 127, %v129_v10 }
  0x66   :  { %536 = vrot.lane.b32.xlu1 %v1240_v58, %s1123_s4  ;;  %144 = vrot.lane.b32.xlu0 %v1243_v59, %s1123_s4  ;;  %v509_v60 = vadd.f32 %v508_v54, %v507_v48  ;;  %v525_v61 = vmax.f32 %v523_v49, %v524_v55  ;;  %v104_v62 = vadd.f32 %v103_v56, %v102_v50  ;;  %vm1130_vm10 = vmmov 1  }
  0x67   :  { %v121_v1 = vmax.f32 %v119_v51, %v120_v57  ;;  %v180_v15 = vsub.s32 3, %v135_v13  ;;  %v153_v19 = vsub.s32 1, %v135_v13  ;;  %v170_v24 = vsub.s32 2, %v135_v13  ;;  %vm1374_vm11 = vmpackc.low %vm274_vm9, %vm1130_vm10 }
  0x68   :  { %v511_v63 = vmul.f32 0.25, %v509_v60  ;;  %v107_v0 = vmul.f32 0.25, %v104_v62  ;;  %vm148_vm2 = vcmp.lt.s32.totalorder %v1267_v17, 2  ;;  %v214_v26 = vsub.s32 5, %v135_v13 }
  0x69   :  { %v185_v22 = vrot.slane %v85_v21, %v180_v15  ;;  %v181_v23 = vrot.slane %v84_v20, %v180_v15  ;;  %v1270_v28 = vsub.s32 0, %v135_v13  ;;  %v154_v29 = vrot.slane %v84_v20, %v153_v19 }
  0x6a   :  { %v1248_v2 = vsel %vm122_vm1, %v511_v63, %v525_v61  ;;  %161 = vrot.lane.b32.xlu0 %v1243_v59, %s1124_s24  ;;  %v124_v3 = vsel %vm122_vm1, %v107_v0, %v121_v1  ;;  %v158_v30 = vrot.slane %v85_v21, %v153_v19  ;;  %vm165_vm3 = vcmp.lt.s32.totalorder %v1267_v17, 1 }
  0x6b   :  { %538 = vrot.lane.b32.xlu1 %v1248_v2, %s1123_s4  ;;  %v231_v31 = vsub.s32 6, %v135_v13  ;;  %v1273_v32 = vmul.f32 %v185_v22, %v124_v3  ;;  %v1276_v33 = vmul.f32 %v181_v23, %v1243_v59  ;;  %v1279_v34 = vmul.f32 %v1248_v2, %v185_v22 }
  0x6c   :  { %v1282_v35 = vmul.f32 %v1240_v58, %v181_v23  ;;  %v171_v36 = vrot.slane %v84_v20, %v170_v24  ;;  %v175_v37 = vrot.slane %v85_v21, %v170_v24  ;;  %vm209_vm4 = vcmp.lt.s32.totalorder %v1267_v17, 126 }
  0x6d   :  { %v197_v39 = vsub.s32 4, %v135_v13  ;;  %v215_v40 = vrot.slane %v84_v20, %v214_v26  ;;  %v219_v41 = vrot.slane %v85_v21, %v214_v26  ;;  %vm131_vm5 = vcmp.lt.s32.totalorder %v1267_v17, 3 }
  0x6e   :  { %205 = vrot.lane.b32.xlu0 %v1243_v59, %s1125_s0  ;;  %v137_v43 = vrot.slane %v84_v20, %v1270_v28  ;;  %v141_v44 = vrot.slane %v85_v21, %v1270_v28  ;;  %vm226_vm7 = vcmp.lt.s32.totalorder %v1267_v17, 125  ;;  %v1289_v45 = vrot.slane %v84_v20, %v231_v31 }
  0x6f   :  { %163 = vrot.lane.b32.xlu1 %v124_v3, %s1124_s24  ;;  %v1291_v46 = vrot.slane %v85_v21, %v231_v31  ;;  %v254_v47 = vrot.slane %v1273_v32, 2  ;;  %v253_v48 = vrot.slane %v1276_v33, 2  ;;  %v593_v49 = vrot.slane %v1279_v34, 2 }
  0x70   :  { %v592_v50 = vrot.slane %v1282_v35, 2  ;;  %v1301_v54 = vrot.slane %v84_v20, %v197_v39  ;;  %v1303_v55 = vrot.slane %v85_v21, %v197_v39  ;;  %vm192_vm8 = vcmp.lt.s32.totalorder %v1267_v17, 127 }
  0x71   :  { %vm283_vm12 = vcmask 130048   ;;  %vm379_vm13 = vcmp.lt.s32.totalorder %v1267_v17, 32  ;;  %vm362_vm14 = vcmp.lt.s32.totalorder %v1267_v17, 48  ;;  %vm400_vm15 = vcmp.lt.s32.totalorder %v1267_v17, 16 }
  0x72   :  { %544 = vrot.lane.b32.xlu0 %v1240_v58, %s1124_s24 }
  0x73   :  { %207 = vrot.lane.b32.xlu1 %v124_v3, %s1125_s0 }
  0x76   :  { %146 = vrot.lane.b32.xlu0 %v124_v3, %s1123_s4  ;;  %s907_s4 = sshll.u32 %s1137_s23, 4  ;;  %s908_s4 = int_to_ptr.vmem [resolvable:$true] %s907_s4 }
  0x77   :  { %546 = vrot.lane.b32.xlu1 %v1248_v2, %s1124_s24  ;;  %s1084_s24 = scalar_lea.vmem %s908_s4, 256  ;;  %p1089_p8 = scmp.lt.s32.totalorder %s908_s4, %s908_s4 }
  0x78   :  { %p1085_p7 = scmp.ne.s32.totalorder %s908_s4, %s1084_s24  ;;  %p1090_p9 = scmp.lt.s32.totalorder %s1084_s24, %s1084_s24 }
  0x7a   :  { %562 = vrot.lane.b32.xlu0 %v1240_v58, %s1125_s0  ;;  %p1091_p10 = por %p1090_p9, %p1089_p8 }
  0x7b   :  { %564 = vrot.lane.b32.xlu1 %v1248_v2, %s1125_s0 }
  0x7c   :  { %p1092_p11 = pnand %p1091_p10, %p1085_p7 }
  0x7e   :  { %125 = vrot.lane.b32.xlu0 %v1243_v59, %s1126_s25 }
  0x7f   :  { %127 = vrot.lane.b32.xlu1 %v124_v3, %s1126_s25 }
  0x82   :  { %222 = vrot.lane.b32.xlu0 %v1243_v59, %s1127_s26 }
  0x83   :  { %224 = vrot.lane.b32.xlu1 %v124_v3, %s1127_s26 }
  0x86   :  { %528 = vrot.lane.b32.xlu0 %v1240_v58, %s1126_s25 }
  0x87   :  { %530 = vrot.lane.b32.xlu1 %v1248_v2, %s1126_s25 }
  0x8a   :  { %570 = vrot.lane.b32.xlu0 %v1240_v58, %s1127_s26 }
  0x8b   :  { %572 = vrot.lane.b32.xlu1 %v1248_v2, %s1127_s26 }
  0x8e   :  { %188 = vrot.lane.b32.xlu0 %v1243_v59, %s1129_s27 }
  0x8f   :  { %190 = vrot.lane.b32.xlu1 %v124_v3, %s1129_s27 }
  0x92   :  { %554 = vrot.lane.b32.xlu0 %v1240_v58, %s1129_s27 }
  0x93   :  { %556 = vrot.lane.b32.xlu1 %v1248_v2, %s1129_s27 }
  0xd8   :  { %v537_v5 = vpop.permute.xlu1 %536  ;;  %v145_v6 = vpop.permute.xlu0 %144 }
  0xdc   :  { %v162_v7 = vpop.permute.xlu0 %161 }
  0xdd   :  { %v539_v8 = vpop.permute.xlu1 %538 }
  0xde   :  { %v540_v56 = vsel %vm148_vm2, %v537_v5, %v539_v8  ;;  %v541_v57 = vsel %vm148_vm2, %v539_v8, %v537_v5 }
  0xdf   :  { %v542_v5 = vmul.f32 %v541_v57, %v154_v29 }
  0xe0   :  { %v206_v9 = vpop.permute.xlu0 %205 }
  0xe1   :  { %v164_v11 = vpop.permute.xlu1 %163  ;;  %v580_v24 = vrot.slane %v542_v5, 6 }
  0xe2   :  { %v166_v58 = vsel %vm165_vm3, %v162_v7, %v164_v11  ;;  %v167_v59 = vsel %vm165_vm3, %v164_v11, %v162_v7 }
  0xe3   :  { %v176_v7 = vmul.f32 %v171_v36, %v167_v59  ;;  %v177_v8 = vmul.f32 %v175_v37, %v166_v58 }
  0xe4   :  { %v545_v12 = vpop.permute.xlu0 %544 }
  0xe5   :  { %v208_v14 = vpop.permute.xlu1 %207  ;;  %v247_v39 = vrot.slane %v176_v7, 4 }
  0xe6   :  { %v210_v61 = vsel %vm209_vm4, %v206_v9, %v208_v14  ;;  %v211_v62 = vsel %vm209_vm4, %v208_v14, %v206_v9 }
  0xe8   :  { %v147_v16 = vpop.permute.xlu0 %146 }
  0xe9   :  { %v547_v18 = vpop.permute.xlu1 %546  ;;  %v149_v51 = vsel %vm148_vm2, %v145_v6, %v147_v16  ;;  %v150_v52 = vsel %vm148_vm2, %v147_v16, %v145_v6  ;;  %v543_v6 = vmul.f32 %v540_v56, %v158_v30  ;;  %v221_v16 = vmul.f32 %v219_v41, %v211_v62 }
  0xea   :  { %v548_v1 = vsel %vm165_vm3, %v545_v12, %v547_v18  ;;  %v549_v2 = vsel %vm165_vm3, %v547_v18, %v545_v12  ;;  %v159_v3 = vmul.f32 %v154_v29, %v150_v52  ;;  %v160_v4 = vmul.f32 %v158_v30, %v149_v51 }
  0xeb   :  { %v220_v12 = vmul.f32 %v215_v40, %v210_v61  ;;  %v550_v18 = vmul.f32 %v549_v2, %v171_v36  ;;  %v551_v19 = vmul.f32 %v548_v1, %v175_v37  ;;  %v581_v26 = vrot.slane %v543_v6, 6 }
  0xec   :  { %v563_v25 = vpop.permute.xlu0 %562  ;;  %v241_v20 = vrot.slane %v159_v3, 6  ;;  %v242_v21 = vrot.slane %v160_v4, 6  ;;  %v260_v57 = vrot.slane %v221_v16, 6  ;;  %vm448_vm2 = vcmp.lt.s32.totalorder %v1267_v17, 96 }
  0xed   :  { %v565_v27 = vpop.permute.xlu1 %564  ;;  %v259_v56 = vrot.slane %v220_v12, 6  ;;  %vm467_vm3 = vcmp.lt.s32.totalorder %v1267_v17, 80 }
  0xee   :  { %v566_v10 = vsel %vm209_vm4, %v563_v25, %v565_v27  ;;  %v567_v11 = vsel %vm209_vm4, %v565_v27, %v563_v25 }
  0xef   :  { %v568_v29 = vmul.f32 %v566_v10, %v215_v40  ;;  %v569_v30 = vmul.f32 %v567_v11, %v219_v41  ;;  %v586_v40 = vrot.slane %v550_v18, 4  ;;  %v587_v41 = vrot.slane %v551_v19, 4 }
  0xf0   :  { %v126_v38 = vpop.permute.xlu0 %125 }
  0xf1   :  { %v128_v42 = vpop.permute.xlu1 %127 }
  0xf2   :  { %v132_v63 = vsel %vm131_vm5, %v126_v38, %v128_v42  ;;  %v133_v0 = vsel %vm131_vm5, %v128_v42, %v126_v38  ;;  %v248_v42 = vrot.slane %v177_v8, 4 }
  0xf3   :  { %v142_v13 = vmul.f32 %v137_v43, %v133_v0  ;;  %v143_v14 = vmul.f32 %v141_v44, %v132_v63  ;;  %v599_v63 = vrot.slane %v569_v30, 6  ;;  %v81_v30 = vld [vmem:[#allocation6] sm:$0xff] }
  0xf4   :  { %v223_v53 = vpop.permute.xlu0 %222 }
  0xf5   :  { %v225_v60 = vpop.permute.xlu1 %224  ;;  %v270_v27 = vsel %vm269_vm6, %v142_v13, %v241_v20  ;;  %v271_v38 = vsel %vm269_vm6, %v143_v14, %v242_v21 }
  0xf6   :  { %v227_v31 = vsel %vm226_vm7, %v223_v53, %v225_v60  ;;  %v228_v36 = vsel %vm226_vm7, %v225_v60, %v223_v53  ;;  %v273_v62 = vsel %vm90_vm0, %v271_v38, %v248_v42  ;;  %v272_v53 = vsel %vm90_vm0, %v270_v27, %v247_v39 }
  0xf7   :  { %v237_v58 = vmul.f32 %v1289_v45, %v227_v31  ;;  %v238_v59 = vmul.f32 %v1291_v46, %v228_v36  ;;  %v598_v60 = vrot.slane %v568_v29, 6  ;;  %v276_v7 = vsel %vm274_vm9, %v273_v62, %v254_v47 }
  0xf8   :  { %v529_v9 = vpop.permute.xlu0 %528  ;;  %v275_v8 = vsel %vm274_vm9, %v272_v53, %v253_v48 }
  0xf9   :  { %v531_v15 = vpop.permute.xlu1 %530  ;;  %v266_v10 = vrot.slane %v238_v59, 4 }
  0xfa   :  { %v532_v22 = vsel %vm131_vm5, %v529_v9, %v531_v15  ;;  %v533_v23 = vsel %vm131_vm5, %v531_v15, %v529_v9  ;;  %v265_v9 = vrot.slane %v237_v58, 4 }
  0xfb   :  { %v534_v51 = vmul.f32 %v533_v23, %v137_v43  ;;  %v535_v52 = vmul.f32 %v532_v22, %v141_v44 }
  0xfc   :  { %v571_v25 = vpop.permute.xlu0 %570 }
  0xfd   :  { %v573_v37 = vpop.permute.xlu1 %572  ;;  %v608_v1 = vsel %vm269_vm6, %v534_v51, %v580_v24  ;;  %v609_v4 = vsel %vm269_vm6, %v535_v52, %v581_v26 }
  0xfe   :  { %v574_v0 = vsel %vm226_vm7, %v571_v25, %v573_v37  ;;  %v575_v43 = vsel %vm226_vm7, %v573_v37, %v571_v25  ;;  %v611_v32 = vsel %vm90_vm0, %v609_v4, %v587_v41  ;;  %v610_v47 = vsel %vm90_vm0, %v608_v1, %v586_v40 }
  0xff   :  { %v576_v11 = vmul.f32 %v574_v0, %v1289_v45  ;;  %v577_v13 = vmul.f32 %v575_v43, %v1291_v46  ;;  %v612_v25 = vsel %vm274_vm9, %v610_v47, %v592_v50 }
 0x100   :  { %v189_v61 = vpop.permute.xlu0 %188 }
 0x101   :  { %v191_v44 = vpop.permute.xlu1 %190  ;;  %v604_v23 = vrot.slane %v576_v11, 4  ;;  %v605_v24 = vrot.slane %v577_v13, 4  ;;  %v1431_v11 = vld [vmem:[#allocation7] sm:$0x7f]  ;;  %v1433_v13 = vld [vmem:[#allocation7 + $0x8] sm:$0x7f] }
 0x102   :  { %v193_v2 = vsel %vm192_vm8, %v189_v61, %v191_v44  ;;  %v194_v3 = vsel %vm192_vm8, %v191_v44, %v189_v61  ;;  %v384_v47 = vrot.slane %v1431_v11, 1 }
 0x103   :  { %v203_v5 = vmul.f32 %v1301_v54, %v193_v2  ;;  %v204_v6 = vmul.f32 %v1303_v55, %v194_v3 }
 0x104   :  { %v555_v14 = vpop.permute.xlu0 %554 }
 0x105   :  { %v557_v15 = vpop.permute.xlu1 %556  ;;  %v278_v12 = vsel %vm269_vm6, %v204_v6, %v260_v57  ;;  %v277_v16 = vsel %vm269_vm6, %v203_v5, %v259_v56 }
 0x106   :  { %v558_v33 = vsel %vm192_vm8, %v555_v14, %v557_v15  ;;  %v559_v48 = vsel %vm192_vm8, %v557_v15, %v555_v14  ;;  %v280_v45 = vsel %vm90_vm0, %v278_v12, %v266_v10  ;;  %v279_v18 = vsel %vm90_vm0, %v277_v16, %v265_v9 }
 0x107   :  { %v560_v19 = vmul.f32 %v558_v33, %v1301_v54  ;;  %v561_v20 = vmul.f32 %v559_v48, %v1303_v55  ;;  %v929_v21 = vpack.c.bf16 %v280_v45, %v276_v7  ;;  %v932_v22 = vpack.c.bf16 %v279_v18, %v275_v8 }
 0x108   :  { %v613_v54 = vsel %vm274_vm9, %v611_v32, %v593_v49  ;;  %v385_v33 = vrot.slane %v1433_v13, 1  ;;  %v403_v48 = vrot.slane %v1431_v11, 2  ;;  %v404_v45 = vrot.slane %v1433_v13, 2 }
 0x109   :  { %931 = vmatprep.subr.msk.bf16.mxu0 %vm1374_vm11, %v929_v21  ;;  %v615_v26 = vsel %vm269_vm6, %v561_v20, %v599_v63  ;;  %v614_v29 = vsel %vm269_vm6, %v560_v19, %v598_v60 }
 0x10a   :  { %934 = vmatpush1.bf16.msk.msra.mxu0 %vm1374_vm11, %v932_v22  ;;  %v617_v55 = vsel %vm90_vm0, %v615_v26, %v605_v24  ;;  %v616_v27 = vsel %vm90_vm0, %v614_v29, %v604_v23  ;;  %vm429_vm0 = vcmp.lt.s32.totalorder %v1267_v17, 112 }
 0x10b   :  { %v935_v31 = vpack.c.bf16 %v617_v55, %v613_v54  ;;  %v938_v36 = vpack.c.bf16 %v616_v27, %v612_v25 }
 0x10d   :  { %924 = vmatmul.mubr.msk.f32.vlgmr.msra.gmra.mrb[0].mxu0 %vm283_vm12, %v81_v30  ;;  %937 = vmatprep.subr.msk.bf16.mxu1 %vm1374_vm11, %v935_v31 }
 0x10e   :  { %940 = vmatpush1.bf16.msk.msra.mxu1 %vm1374_vm11, %v938_v36 }
 0x111   :  { %927 = vmatmul.mubr.msk.f32.vlgmr.msra.gmra.mrb[0].mxu1 %vm283_vm12, %v81_v30 }
 0x1e0   :  { %v1399_v34 = vpop.f32.mrb[0].mxu0 }
 0x1e1   :  { %358 = vrot.lane.b32.xlu0 %v1399_v34, %s1131_s28  ;;  %v1402_v35 = vpop.f32.mrb[1].mxu0  ;;  %v371_v37 = vrot.slane %v1399_v34, 1  ;;  %v392_v51 = vrot.slane %v1399_v34, 2  ;;  %v421_v40 = vrot.slane %v1399_v34, 4  ;;  %v440_v61 = vrot.slane %v1399_v34, 5 }
 0x1e2   :  { %360 = vrot.lane.b32.xlu1 %v1402_v35, %s1131_s28  ;;  %v372_v38 = vrot.slane %v1402_v35, 1  ;;  %v393_v52 = vrot.slane %v1402_v35, 2  ;;  %v422_v41 = vrot.slane %v1402_v35, 4  ;;  %v441_v62 = vrot.slane %v1402_v35, 5 }
 0x1e3   :  { %v459_v63 = vrot.slane %v1399_v34, 6  ;;  %v460_v0 = vrot.slane %v1402_v35, 6  ;;  %v1437_v12 = vmul.f32 %v1399_v34, %v1431_v11  ;;  %v1441_v16 = vmul.f32 %v1402_v35, %v1433_v13 }
 0x1e4   :  { %v1405_v49 = vpop.f32.mrb[0].mxu1 }
 0x1e5   :  { %v1407_v50 = vpop.f32.mrb[1].mxu1  ;;  %691 = vrot.lane.b32.xlu0 %v1405_v49, %s1131_s28  ;;  %v703_v39 = vrot.slane %v1405_v49, 1  ;;  %v717_v56 = vrot.slane %v1405_v49, 2  ;;  %v741_v58 = vrot.slane %v1405_v49, 4  ;;  %v755_v53 = vrot.slane %v1405_v49, 5 }
 0x1e6   :  { %693 = vrot.lane.b32.xlu1 %v1407_v50, %s1131_s28  ;;  %v704_v42 = vrot.slane %v1407_v50, 1  ;;  %v718_v57 = vrot.slane %v1407_v50, 2  ;;  %v742_v59 = vrot.slane %v1407_v50, 4  ;;  %v756_v60 = vrot.slane %v1407_v50, 5 }
 0x1e7   :  { %v769_v43 = vrot.slane %v1405_v49, 6  ;;  %v770_v44 = vrot.slane %v1407_v50, 6  ;;  %v1446_v32 = vmul.f32 %v1405_v49, %v1431_v11  ;;  %v415_v20 = vrot.slane %v1437_v12, 3 }
 0x1e8   :  { %v416_v21 = vrot.slane %v1441_v16, 3  ;;  %v1458_v26 = vmul.f32 %v1407_v50, %v1433_v13 }
 0x1e9   :  { %375 = vrot.lane.b32.xlu0 %v371_v37, %s1132_s29  ;;  %v735_v29 = vrot.slane %v1446_v32, 3 }
 0x1ea   :  { %377 = vrot.lane.b32.xlu1 %v372_v38, %s1132_s29 }
 0x1ed   :  { %707 = vrot.lane.b32.xlu0 %v703_v39, %s1132_s29 }
 0x1ee   :  { %709 = vrot.lane.b32.xlu1 %v704_v42, %s1132_s29 }
 0x1f1   :  { %396 = vrot.lane.b32.xlu0 %v392_v51, %s1133_s30 }
 0x1f2   :  { %398 = vrot.lane.b32.xlu1 %v393_v52, %s1133_s30 }
 0x1f5   :  { %721 = vrot.lane.b32.xlu0 %v717_v56, %s1133_s30 }
 0x1f6   :  { %723 = vrot.lane.b32.xlu1 %v718_v57, %s1133_s30 }
 0x1f9   :  { %425 = vrot.lane.b32.xlu0 %v421_v40, %s1134_s6 }
 0x1fa   :  { %427 = vrot.lane.b32.xlu1 %v422_v41, %s1134_s6  ;;  %v432_v41 = vrot.slane %v1431_v11, 4 }
 0x1fd   :  { %745 = vrot.lane.b32.xlu0 %v741_v58, %s1134_s6 }
 0x1fe   :  { %747 = vrot.lane.b32.xlu1 %v742_v59, %s1134_s6 }
 0x201   :  { %444 = vrot.lane.b32.xlu0 %v440_v61, %s1135_s7 }
 0x202   :  { %446 = vrot.lane.b32.xlu1 %v441_v62, %s1135_s7 }
 0x205   :  { %759 = vrot.lane.b32.xlu0 %v755_v53, %s1135_s7 }
 0x206   :  { %761 = vrot.lane.b32.xlu1 %v756_v60, %s1135_s7 }
 0x209   :  { %463 = vrot.lane.b32.xlu0 %v459_v63, %s1136_s8 }
 0x20a   :  { %465 = vrot.lane.b32.xlu1 %v460_v0, %s1136_s8  ;;  %v433_v0 = vrot.slane %v1433_v13, 4 }
 0x20d   :  { %773 = vrot.lane.b32.xlu0 %v769_v43, %s1136_s8 }
 0x20e   :  { %775 = vrot.lane.b32.xlu1 %v770_v44, %s1136_s8 }
 0x253   :  { %v359_v1 = vpop.permute.xlu0 %358 }
 0x254   :  { %v361_v2 = vpop.permute.xlu1 %360 }
 0x255   :  { %v363_v30 = vsel %vm362_vm14, %v359_v1, %v361_v2  ;;  %v364_v54 = vsel %vm362_vm14, %v361_v2, %v359_v1 }
 0x256   :  { %v365_v42 = vmul.f32 %v364_v54, %v1431_v11  ;;  %v366_v51 = vmul.f32 %v363_v30, %v1433_v13 }
 0x257   :  { %v692_v3 = vpop.permute.xlu0 %691 }
 0x258   :  { %v694_v4 = vpop.permute.xlu1 %693 }
 0x259   :  { %v695_v27 = vsel %vm362_vm14, %v692_v3, %v694_v4  ;;  %v696_v31 = vsel %vm362_vm14, %v694_v4, %v692_v3  ;;  %v736_v4 = vrot.slane %v1458_v26, 3 }
 0x25a   :  { %v697_v57 = vmul.f32 %v696_v31, %v1431_v11  ;;  %v698_v40 = vmul.f32 %v695_v27, %v1433_v13 }
 0x25b   :  { %v376_v5 = vpop.permute.xlu0 %375 }
 0x25c   :  { %v378_v6 = vpop.permute.xlu1 %377 }
 0x25d   :  { %v380_v18 = vsel %vm379_vm13, %v376_v5, %v378_v6  ;;  %v381_v19 = vsel %vm379_vm13, %v378_v6, %v376_v5  ;;  %v451_v5 = vrot.slane %v1431_v11, 5  ;;  %v452_v6 = vrot.slane %v1433_v13, 5 }
 0x25e   :  { %v388_v36 = vmul.f32 %v384_v47, %v381_v19  ;;  %v389_v34 = vmul.f32 %v385_v33, %v380_v18  ;;  %v471_v18 = vrot.slane %v1433_v13, 6 }
 0x25f   :  { %v708_v7 = vpop.permute.xlu0 %707 }
 0x260   :  { %v710_v8 = vpop.permute.xlu1 %709  ;;  %v390_v58 = vadd.f32 %v388_v36, %v365_v42  ;;  %v391_v59 = vadd.f32 %v389_v34, %v366_v51 }
 0x261   :  { %v711_v23 = vsel %vm379_vm13, %v708_v7, %v710_v8  ;;  %v712_v24 = vsel %vm379_vm13, %v710_v8, %v708_v7 }
 0x262   :  { %v713_v49 = vmul.f32 %v712_v24, %v384_v47  ;;  %v714_v50 = vmul.f32 %v711_v23, %v385_v33 }
 0x263   :  { %v397_v9 = vpop.permute.xlu0 %396 }
 0x264   :  { %v399_v10 = vpop.permute.xlu1 %398  ;;  %v715_v60 = vadd.f32 %v713_v49, %v697_v57  ;;  %v716_v63 = vadd.f32 %v714_v50, %v698_v40 }
 0x265   :  { %v401_v55 = vsel %vm400_vm15, %v397_v9, %v399_v10  ;;  %v402_v25 = vsel %vm400_vm15, %v399_v10, %v397_v9 }
 0x266   :  { %v407_v52 = vmul.f32 %v403_v48, %v402_v25  ;;  %v408_v56 = vmul.f32 %v404_v45, %v401_v55 }
 0x267   :  { %v722_v14 = vpop.permute.xlu0 %721 }
 0x268   :  { %v724_v15 = vpop.permute.xlu1 %723  ;;  %v409_v44 = vadd.f32 %v407_v52, %v390_v58  ;;  %v410_v1 = vadd.f32 %v408_v56, %v391_v59 }
 0x269   :  { %v725_v37 = vsel %vm400_vm15, %v722_v14, %v724_v15  ;;  %v726_v38 = vsel %vm400_vm15, %v724_v15, %v722_v14 }
 0x26a   :  { %v727_v61 = vmul.f32 %v726_v38, %v403_v48  ;;  %v728_v62 = vmul.f32 %v725_v37, %v404_v45  ;;  %v419_v48 = vadd.f32 %v415_v20, %v409_v44  ;;  %v420_v45 = vadd.f32 %v416_v21, %v410_v1 }
 0x26b   :  { %v426_v46 = vpop.permute.xlu0 %425 }
 0x26c   :  { %v428_v22 = vpop.permute.xlu1 %427  ;;  %v729_v7 = vadd.f32 %v727_v61, %v715_v60  ;;  %v730_v8 = vadd.f32 %v728_v62, %v716_v63 }
 0x26d   :  { %v430_v2 = vsel %vm429_vm0, %v426_v46, %v428_v22  ;;  %v431_v3 = vsel %vm429_vm0, %v428_v22, %v426_v46  ;;  %v470_v46 = vrot.slane %v1431_v11, 6 }
 0x26e   :  { %v436_v15 = vmul.f32 %v432_v41, %v430_v2  ;;  %v437_v12 = vmul.f32 %v433_v0, %v431_v3  ;;  %v739_v20 = vadd.f32 %v735_v29, %v729_v7  ;;  %v740_v21 = vadd.f32 %v736_v4, %v730_v8 }
 0x26f   :  { %v746_v35 = vpop.permute.xlu0 %745 }
 0x270   :  { %v748_v39 = vpop.permute.xlu1 %747  ;;  %v438_v55 = vadd.f32 %v436_v15, %v419_v48  ;;  %v439_v25 = vadd.f32 %v437_v12, %v420_v45 }
 0x271   :  { %v749_v16 = vsel %vm429_vm0, %v746_v35, %v748_v39  ;;  %v750_v47 = vsel %vm429_vm0, %v748_v39, %v746_v35 }
 0x272   :  { %v751_v26 = vmul.f32 %v749_v16, %v432_v41  ;;  %v752_v30 = vmul.f32 %v750_v47, %v433_v0 }
 0x273   :  { %v445_v53 = vpop.permute.xlu0 %444 }
 0x274   :  { %v447_v43 = vpop.permute.xlu1 %446  ;;  %v753_v37 = vadd.f32 %v751_v26, %v739_v20  ;;  %v754_v38 = vadd.f32 %v752_v30, %v740_v21 }
 0x275   :  { %v449_v9 = vsel %vm448_vm2, %v445_v53, %v447_v43  ;;  %v450_v10 = vsel %vm448_vm2, %v447_v43, %v445_v53 }
 0x276   :  { %v455_v19 = vmul.f32 %v451_v5, %v449_v9  ;;  %v456_v22 = vmul.f32 %v452_v6, %v450_v10 }
 0x277   :  { %v760_v14 = vpop.permute.xlu0 %759 }
 0x278   :  { %v762_v33 = vpop.permute.xlu1 %761  ;;  %v457_v34 = vadd.f32 %v455_v19, %v438_v55  ;;  %v458_v35 = vadd.f32 %v456_v22, %v439_v25 }
 0x279   :  { %v763_v23 = vsel %vm448_vm2, %v760_v14, %v762_v33  ;;  %v764_v24 = vsel %vm448_vm2, %v762_v33, %v760_v14 }
 0x27a   :  { %v765_v27 = vmul.f32 %v763_v23, %v451_v5  ;;  %v766_v13 = vmul.f32 %v764_v24, %v452_v6 }
 0x27b   :  { %v464_v54 = vpop.permute.xlu0 %463 }
 0x27c   :  { %v466_v11 = vpop.permute.xlu1 %465  ;;  %v767_v51 = vadd.f32 %v765_v27, %v753_v37  ;;  %v768_v52 = vadd.f32 %v766_v13, %v754_v38 }
 0x27d   :  { %v468_v31 = vsel %vm467_vm3, %v464_v54, %v466_v11  ;;  %v469_v36 = vsel %vm467_vm3, %v466_v11, %v464_v54 }
 0x27e   :  { %v474_v49 = vmul.f32 %v470_v46, %v468_v31  ;;  %v475_v50 = vmul.f32 %v471_v18, %v469_v36 }
 0x27f   :  { %v774_v39 = vpop.permute.xlu0 %773 }
 0x280   :  { %v1513_v42 = vadd.f32 %v474_v49, %v457_v34  ;;  %v1515_v32 = vadd.f32 %v475_v50, %v458_v35  ;;  %v776_v29 = vpop.permute.xlu1 %775 }
 0x281   :  { %v777_v56 = vsel %vm467_vm3, %v774_v39, %v776_v29  ;;  %v778_v57 = vsel %vm467_vm3, %v776_v29, %v774_v39 }
 0x282   :  { %v779_v40 = vmul.f32 %v777_v56, %v470_v46  ;;  %v780_v41 = vmul.f32 %v778_v57, %v471_v18  ;;  %v478_v58 = vsel %vm122_vm1, %v1513_v42, 0.0  ;;  %v479_v59 = vsel %vm122_vm1, %v1515_v32, 0.0 }
 0x283   :  { %v480_v61 = vadd.f32 %v479_v59, %v478_v58 }
 0x284   :  { %v1525_v62 = vadd.f32 %v779_v40, %v767_v51  ;;  %v1527_v53 = vadd.f32 %v780_v41, %v768_v52 }
 0x285   :  { %481 = vadd.xlane.f32.xlu0 %v480_v61 }
 0x286   :  { %v783_v60 = vsel %vm122_vm1, %v1525_v62, 0.0  ;;  %v784_v17 = vsel %vm122_vm1, %v1527_v53, 0.0 }
 0x287   :  { %v785_v63 = vadd.f32 %v784_v17, %v783_v60 }
 0x289   :  { %786 = vadd.xlane.f32.xlu1 %v785_v63 }
 0x312   :  { %v482_v0 = vpop.xlane.xlu0 %481 }
 0x313   :  { %v483_v43 = vrot.slane %v482_v0, 4 }
 0x315   :  { %v484_v44 = vadd.f32 %v483_v43, %v482_v0 }
 0x316   :  { %v787_v1 = vpop.xlane.xlu1 %786 }
 0x317   :  { %v485_v2 = vrot.slane %v484_v44, 2  ;;  %v788_v3 = vrot.slane %v787_v1, 4 }
 0x319   :  { %v789_v4 = vadd.f32 %v788_v3, %v787_v1  ;;  %v486_v5 = vadd.f32 %v485_v2, %v484_v44 }
 0x31b   :  { %v790_v6 = vrot.slane %v789_v4, 2  ;;  %v487_v7 = vrot.slane %v486_v5, 1 }
 0x31d   :  { %v791_v8 = vadd.f32 %v790_v6, %v789_v4  ;;  %v488_v9 = vadd.f32 %v487_v7, %v486_v5 }
 0x31f   :  { %941 = vpush %v488_v9  ;;  %v792_v10 = vrot.slane %v791_v8, 1 }
 0x321   :  { %v793_v14 = vadd.f32 %v792_v10, %v791_v8 }
 0x323   :  { %943 = vpush %v793_v14  ;;  %v886_v14 = vld [vmem:[#allocation10 + $0x8] sm:$0xff] }
 0x350   :  { %s942_s9 = spop %941 }
 0x354   :  { %s944_s10 = spop %943 }
 0x355   :  { %s795_s11 = sadd.f32 %s944_s10, %s942_s9 }
 0x357   :  { %s1533_s1 = smul.f32 0.001953125, %s795_s11 }
 0x359   :  { %v799_v15 = vstv %s1533_s1 }
 0x35a   :  { %v800_v12 = vsub.f32 %v1513_v42, %v799_v15  ;;  %v801_v16 = vsub.f32 %v1515_v32, %v799_v15  ;;  %v817_v47 = vsub.f32 %v1525_v62, %v799_v15  ;;  %v818_v33 = vsub.f32 %v1527_v53, %v799_v15  ;;  %v985_v15 = vld [vmem:[#allocation10] sm:$0xff] }
 0x35c   :  { %v802_v48 = vmul.f32 %v800_v12, %v800_v12  ;;  %v803_v45 = vmul.f32 %v801_v16, %v801_v16  ;;  %v819_v46 = vmul.f32 %v817_v47, %v817_v47  ;;  %v820_v18 = vmul.f32 %v818_v33, %v818_v33 }
 0x35e   :  { %v804_v19 = vsel %vm122_vm1, %v802_v48, 0.0  ;;  %v805_v22 = vsel %vm122_vm1, %v803_v45, 0.0  ;;  %v821_v24 = vsel %vm122_vm1, %v819_v46, 0.0  ;;  %v822_v26 = vsel %vm122_vm1, %v820_v18, 0.0 }
 0x35f   :  { %v806_v23 = vadd.f32 %v805_v22, %v804_v19  ;;  %v823_v30 = vadd.f32 %v822_v26, %v821_v24 }
 0x361   :  { %807 = vadd.xlane.f32.xlu0 %v806_v23 }
 0x365   :  { %824 = vadd.xlane.f32.xlu0 %v823_v30 }
 0x3ee   :  { %v808_v54 = vpop.xlane.xlu0 %807 }
 0x3ef   :  { %v809_v55 = vrot.slane %v808_v54, 4 }
 0x3f1   :  { %v810_v25 = vadd.f32 %v809_v55, %v808_v54 }
 0x3f2   :  { %v825_v20 = vpop.xlane.xlu0 %824 }
 0x3f3   :  { %v811_v21 = vrot.slane %v810_v25, 2  ;;  %v826_v11 = vrot.slane %v825_v20, 4 }
 0x3f5   :  { %v827_v27 = vadd.f32 %v826_v11, %v825_v20  ;;  %v812_v13 = vadd.f32 %v811_v21, %v810_v25 }
 0x3f7   :  { %v828_v31 = vrot.slane %v827_v27, 2  ;;  %v813_v36 = vrot.slane %v812_v13, 1 }
 0x3f9   :  { %v829_v34 = vadd.f32 %v828_v31, %v827_v27  ;;  %v814_v35 = vadd.f32 %v813_v36, %v812_v13 }
 0x3fb   :  { %945 = vpush %v814_v35  ;;  %v830_v49 = vrot.slane %v829_v34, 1 }
 0x3fd   :  { %v831_v50 = vadd.f32 %v830_v49, %v829_v34 }
 0x3ff   :  { %947 = vpush %v831_v50 }
 0x42c   :  { %s946_s21 = spop %945 }
 0x430   :  { %s948_s12 = spop %947 }
 0x431   :  { %s833_s13 = sadd.f32 %s948_s12, %s946_s21 }
 0x433   :  { %s836_s14 = smul.f32 0.001953125, %s833_s13 }
 0x435   :  { %s838_s15 = sadd.f32 1e-05, %s836_s14 }
 0x437   :  { %v839_v37 = vstv %s838_s15 }
 0x438   :  { %975 = vrsqrt.f32 %v839_v37 }
 0x442   :  { %v976_v38 = vpop.eup %975 }
 0x443   :  { %949 = vpush %v976_v38 }
 0x474   :  { %s950_s17 = spop %949 }
 0x475   :  { %s842_s18 = smul.f32 %s950_s17, %s837_s16 }
 0x477   :  { %s844_s19 = smul.f32 %s842_s18, %s1533_s1  ;;  %v846_v39 = vstv %s842_s18 }
 0x478   :  { %v847_v29 = vmul.f32 %v846_v39, %v1513_v42  ;;  %v848_v51 = vmul.f32 %v846_v39, %v1515_v32  ;;  %v874_v52 = vmul.f32 %v846_v39, %v1525_v62  ;;  %v875_v56 = vmul.f32 %v846_v39, %v1527_v53 }
 0x479   :  { %s845_s22 = ssub.f32 %s928_s2, %s844_s19 }
 0x47b   :  { %v849_v57 = vstv %s845_s22 }
 0x47c   :  { %v850_v40 = vadd.f32 %v849_v57, %v847_v29  ;;  %v851_v41 = vadd.f32 %v849_v57, %v848_v51  ;;  %v876_v58 = vadd.f32 %v874_v52, %v849_v57  ;;  %v877_v59 = vadd.f32 %v875_v56, %v849_v57 }
 0x47e   :  { %v852_v61 = vmul.f32 0.5, %v850_v40  ;;  %v853_v60 = vmul.f32 0.5, %v851_v41  ;;  %v878_v17 = vmul.f32 0.5, %v876_v58  ;;  %v879_v63 = vmul.f32 0.5, %v877_v59 }
 0x480   :  { %977 = vtanh.f32 %v852_v61 }
 0x481   :  { %979 = vtanh.f32 %v853_v60 }
 0x482   :  { %981 = vtanh.f32 %v878_v17 }
 0x483   :  { %983 = vtanh.f32 %v879_v63 }
 0x48a   :  { %v978_v42 = vpop.eup %977 }
 0x48b   :  { %v980_v0 = vpop.eup %979  ;;  %v856_v32 = vadd.f32 1.0, %v978_v42 }
 0x48c   :  { %v982_v43 = vpop.eup %981  ;;  %v857_v62 = vadd.f32 1.0, %v980_v0 }
 0x48d   :  { %v984_v44 = vpop.eup %983  ;;  %v858_v53 = vmul.f32 0.5, %v856_v32  ;;  %v882_v1 = vadd.f32 1.0, %v982_v43 }
 0x48e   :  { %v859_v2 = vmul.f32 0.5, %v857_v62  ;;  %v883_v3 = vadd.f32 1.0, %v984_v44 }
 0x48f   :  { %v863_v4 = vrot.slane %v858_v53, %v1270_v28  ;;  %v884_v5 = vmul.f32 0.5, %v882_v1 }
 0x490   :  { %v867_v6 = vrot.slane %v859_v2, %v1270_v28  ;;  %v885_v7 = vmul.f32 0.5, %v883_v3 }
 0x491   :  { %v890_v8 = vrot.slane %v884_v5, %v1270_v28 }
 0x492   :  { %v870_v9 = vcombine.low %v863_v4, %v867_v6  ;;  %v894_v10 = vrot.slane %v885_v7, %v1270_v28 }
 0x494   :  { %v872_v12 = vmul.f32 %v985_v15, %v870_v9  ;;  %v897_v16 = vcombine.low %v890_v8, %v894_v10 }
 0x496   :  { %873 = vst [vmem:[#allocation12] sm:$0xff] %v872_v12  ;;  %v899_v47 = vmul.f32 %v897_v16, %v886_v14 }
 0x498   :  { %901 = vst [vmem:[#allocation12 + $0x8] sm:$0xff] %v899_v47 }
 0x499   :  { %1095 = shalt.err (!%p1092_p11)
}
 0x49a   :  { %s1096_s26 = scalar_lea.hbm %s1573_s5, 256 }
 0x49b   :  { %p1097_p12 = scmp.ne.s32.totalorder %s1573_s5, %s1096_s26  ;;  %p1100_p13 = scmp.lt.u32.totalorder %s1096_s26, %s1573_s5 }
 0x49d   :  { %p1102_p0 = pnand %p1100_p13, %p1097_p12 }
 0x49f   :  { %1105 = shalt.err (!%p1102_p0)
}
 0x4a0   :  { %913 = dma.vmem_to_hbm [thread:$0]  %s908_s4, 256, %s1573_s5, [#allocation4], %s1121_s3, %s1121_s3, %s1122_s20  }
 0x4a1   :  { %1114 = dma.done.wait [#allocation4], 256  }
 0x4a2   :  { %1115 = vsyncadd [#allocation4], 4294967040 }
 0x4a3   :  { %917 = vsyncpa [#allocation3], 1 }
 0x4a4   :  { %918 = vsyncpa [#allocation8], 1 }
 0x4a5   :  { %919 = vsyncpa [#allocation11], 1 }
 0x4a6   :  { %920 = vsyncpa [#allocation4], 1 }
 0x4a7   :  { %921 = vsyncpa [#allocation5], 1 }

</bundles_post_ra>
